<compile_context>
chip_gen: v7x
topology: tpu7x:2x2x1
jax: 0.10.0
libtpu: 0.0.40
codegen_flags: <defaults>
</compile_context>

<pallas_src>
import numpy as np
import jax
import jax.numpy as jnp
from jax.experimental import pallas as pl
from jax.experimental.pallas import tpu as pltpu

NUM_HEADING_BINS = 12
TWO_PI = float(2.0 * np.pi)
ANGLE_PER_BIN = TWO_PI / NUM_HEADING_BINS

# Fused head row layout: 48 rows (multiple of the 16-row bf16 sublane tile),
# 12-row heading groups aligned to 0 / 16 so their slices are tile-aligned.
_HCL0 = 0                       # heading class logits : rows  0..11
_HDL0 = 16                      # heading deltas       : rows 16..27
_OBJ0 = 32                      # objectness logits    : rows 32..33
_BOX0 = 34                      # box reg LBD|RFU      : rows 34..39
_CTR = 40                       # centerness           : row  40
HEAD_ROWS = 48                  # padded rows are zero and never read

# Packed main output: score | box_min(3) | box_max(3) | angle  -> 8 rows.
OUT_ROWS = 8


def _rpn_kernel(xyz_ref, feat_ref, w1_ref, w2_ref, wh_ref, b12_ref, bh_ref,
                out_ref, ctr_ref):
    # Channels-major: channels on sublanes, points on lanes (lane-dense I/O).
    x = feat_ref[...].astype(jnp.bfloat16)            # (C, TN) bf16 (no-op if bf16 in HBM)
    xyz = xyz_ref[...]                                 # (3, TN) f32

    b1 = b12_ref[:, 0:1]                               # (H, 1) f32
    b2 = b12_ref[:, 1:2]                               # (H, 1) f32

    # Shared per-point MLP: 1x1 convs == channel matmuls (bf16 in, f32 acc).
    h = jnp.dot(w1_ref[...], x, preferred_element_type=jnp.float32) + b1
    h = jnp.maximum(h, 0.0)
    h = jnp.dot(w2_ref[...], h.astype(jnp.bfloat16),
                preferred_element_type=jnp.float32) + b2
    h = jnp.maximum(h, 0.0)                            # (H, TN) f32

    # All five prediction heads fused into a single MXU pass.
    heads = jnp.dot(wh_ref[...], h.astype(jnp.bfloat16),
                    preferred_element_type=jnp.float32) + bh_ref[...]  # (48, TN)

    # softmax(obj)[..., 1] == sigmoid(l1 - l0) exactly.
    score = jax.nn.sigmoid(heads[_OBJ0 + 1:_OBJ0 + 2] - heads[_OBJ0:_OBJ0 + 1])

    # Boxes: XYZLBDRFU_ABS (origins = voted xyz) -> XYZXYZ_ABS.
    box = heads[_BOX0:_BOX0 + 6]                       # (6, TN)
    box_min = xyz - box[0:3]                           # (3, TN)
    box_max = xyz + box[3:6]                           # (3, TN)

    ctr = heads[_CTR:_CTR + 1]                         # (1, TN)

    # Heading: fused first-occurrence running argmax + delta gather over the
    # 12 bins, carried on (1, TN) vregs (unrolled, static slices).
    best = heads[_HCL0:_HCL0 + 1]                      # (1, TN)
    base = jnp.zeros_like(best)                        # argmax * ANGLE_PER_BIN
    delta = heads[_HDL0:_HDL0 + 1]                     # (1, TN)
    for i in range(1, NUM_HEADING_BINS):
        li = heads[_HCL0 + i:_HCL0 + i + 1]
        di = heads[_HDL0 + i:_HDL0 + i + 1]
        better = li > best                             # strict > keeps first max
        best = jnp.where(better, li, best)
        base = jnp.where(better, jnp.float32(i * ANGLE_PER_BIN), base)
        delta = jnp.where(better, di, delta)
    angle = jnp.mod(base + delta, TWO_PI)              # (1, TN)

    # One unmasked full-width store of the packed slab, plus the 1-row ctr.
    out_ref[...] = jnp.concatenate([score, box_min, box_max, angle], axis=0)
    ctr_ref[...] = ctr


def _pack_params(p):
    """bf16 matmul weights + fused, aligned (48, H) head weight + biases."""
    H = p["w1"].shape[0]
    wh = jnp.zeros((HEAD_ROWS, H), jnp.float32)
    wh = wh.at[_HCL0:_HCL0 + 12].set(p["whc"])
    wh = wh.at[_HDL0:_HDL0 + 12].set(p["whd"])
    wh = wh.at[_OBJ0:_OBJ0 + 2].set(p["wobj"])
    wh = wh.at[_BOX0:_BOX0 + 6].set(p["wbox"])
    wh = wh.at[_CTR:_CTR + 1].set(p["wctr"])

    bh = jnp.zeros((HEAD_ROWS,), jnp.float32)
    bh = bh.at[_HCL0:_HCL0 + 12].set(p["bhc"])
    bh = bh.at[_HDL0:_HDL0 + 12].set(p["bhd"])
    bh = bh.at[_OBJ0:_OBJ0 + 2].set(p["bobj"])
    bh = bh.at[_BOX0:_BOX0 + 6].set(p["bbox"])
    bh = bh.at[_CTR:_CTR + 1].set(p["bctr"])

    b12 = jnp.stack([p["b1"], p["b2"]], axis=1)        # (H, 2)
    return dict(
        w1=p["w1"].astype(jnp.bfloat16),
        w2=p["w2"].astype(jnp.bfloat16),
        wh=wh.astype(jnp.bfloat16),
        b12=b12.astype(jnp.float32),
        bh=bh[:, None].astype(jnp.float32),            # (48, 1)
    )


def _choose_tn(N, B, tn_req):
    """Largest multiple-of-128 divisor of N <= tn_req; keep >= 2 grid steps."""
    assert N % 128 == 0, "point count must be a multiple of 128"
    tn = 128
    for k in range(min(tn_req, N) // 128, 0, -1):
        if N % (k * 128) == 0:
            tn = k * 128
            break
    # v7x has 2 TensorCores: keep at least 2 total grid steps when possible.
    while B * (N // tn) < 2 and tn > 128:
        k = tn // 128 - 1
        while k >= 1 and N % (k * 128) != 0:
            k -= 1
        if k < 1:
            break
        tn = k * 128
    return tn


def voting_rpn_forward(voted_xyz, voted_features, params, *, tn=2048):
    """voted_xyz: (B, N, 3) f32; voted_features: (B, C, N) bf16 (preferred) or f32."""
    B, N, _ = voted_xyz.shape
    Bf, C, Nf = voted_features.shape
    assert Bf == B and Nf == N
    tn = _choose_tn(N, B, tn)
    H = params["w1"].shape[0]

    pk = _pack_params(params)
    xyz_t = jnp.transpose(voted_xyz, (0, 2, 1)).astype(jnp.float32)   # tiny (B,3,N)

    grid = (B, N // tn)

    def const_spec(shape):
        return pl.BlockSpec(shape, lambda b, n: (0, 0))

    in_specs = [
        pl.BlockSpec((None, 3, tn), lambda b, n: (b, 0, n)),           # xyz (B,3,N)
        pl.BlockSpec((None, C, tn), lambda b, n: (b, 0, n)),           # feat (B,C,N)
        const_spec((H, C)),                                            # w1 bf16
        const_spec((H, H)),                                            # w2 bf16
        const_spec((HEAD_ROWS, H)),                                    # fused heads bf16
        const_spec((H, 2)),                                            # b1|b2
        const_spec((HEAD_ROWS, 1)),                                    # fused head bias
    ]
    out_specs = [
        pl.BlockSpec((None, OUT_ROWS, tn), lambda b, n: (b, 0, n)),    # packed slab
        pl.BlockSpec((None, 1, tn), lambda b, n: (b, 0, n)),           # centerness
    ]
    out_shapes = (
        jax.ShapeDtypeStruct((B, OUT_ROWS, N), jnp.float32),
        jax.ShapeDtypeStruct((B, 1, N), jnp.float32),
    )

    out, ctr_out = pl.pallas_call(
        _rpn_kernel,
        out_shape=out_shapes,
        grid_spec=pltpu.PrefetchScalarGridSpec(
            num_scalar_prefetch=0,
            grid=grid,
            in_specs=in_specs,
            out_specs=out_specs,
        ),
        compiler_params=pltpu.CompilerParams(
            dimension_semantics=("parallel", "parallel")),
    )(xyz_t, voted_features, pk["w1"], pk["w2"], pk["wh"], pk["b12"], pk["bh"])

    scores = out[:, 0, :]                                    # (B, N)
    boxes = jnp.transpose(out[:, 1:7, :], (0, 2, 1))         # (B, N, 6)
    angles = out[:, 7, :]                                    # (B, N)
    ctr = ctr_out[:, 0, :]                                   # (B, N)

    # eval mode, use_nms=False: keep = arange(N) per batch element.
    keep = jnp.arange(N, dtype=jnp.int32)
    proposals = []
    for i in range(B):
        proposals.append({
            "objectness_scores": scores[i],
            "proposal_boxes_xyzxyz": boxes[i],
            "pred_heading_angles": angles[i],
            "inds": keep,
        })
    losses = {}
    return proposals, losses, (scores, boxes, angles, ctr)


def init_params(key, c_in, hidden):
    """PyTorch-Conv1d-style init; weights in native (out, in) layout."""
    def conv(k, fi, fo):
        kw, kb = jax.random.split(k)
        s = 1.0 / np.sqrt(fi)
        w = jax.random.uniform(kw, (fo, fi), jnp.float32, -s, s)
        b = jax.random.uniform(kb, (fo,), jnp.float32, -s, s)
        return w, b

    keys = jax.random.split(key, 7)
    p = {}
    p["w1"], p["b1"] = conv(keys[0], c_in, hidden)
    p["w2"], p["b2"] = conv(keys[1], hidden, hidden)
    p["wobj"], p["bobj"] = conv(keys[2], hidden, 2)
    p["wbox"], p["bbox"] = conv(keys[3], hidden, 6)
    p["whc"], p["bhc"] = conv(keys[4], hidden, NUM_HEADING_BINS)
    p["whd"], p["bhd"] = conv(keys[5], hidden, NUM_HEADING_BINS)
    p["wctr"], p["bctr"] = conv(keys[6], hidden, 1)
    return p


def ref_forward(voted_xyz, voted_features, p):
    """Pure-JAX reference with the same bf16-matmul / f32-accumulate discipline."""
    f32 = jnp.float32
    bf16 = jnp.bfloat16
    x = voted_features.astype(bf16)                                     # (B, C, N)
    h = jnp.einsum("hc,bcn->bhn", p["w1"].astype(bf16), x,
                   preferred_element_type=f32) + p["b1"][None, :, None]
    h = jax.nn.relu(h)
    h = jnp.einsum("hk,bkn->bhn", p["w2"].astype(bf16), h.astype(bf16),
                   preferred_element_type=f32) + p["b2"][None, :, None]
    h = jax.nn.relu(h)
    hb = h.astype(bf16)

    def head(w, b):
        return jnp.einsum("oh,bhn->bon", w.astype(bf16), hb,
                          preferred_element_type=f32) + b[None, :, None]

    obj = head(p["wobj"], p["bobj"])                 # (B, 2, N)
    box = head(p["wbox"], p["bbox"])                 # (B, 6, N)
    hcl = head(p["whc"], p["bhc"])                   # (B, 12, N)
    hdl = head(p["whd"], p["bhd"])                   # (B, 12, N)
    ctr = head(p["wctr"], p["bctr"])[:, 0, :]        # (B, N)

    score = jax.nn.softmax(obj, axis=1)[:, 1, :]
    cls = jnp.argmax(hcl, axis=1)                    # (B, N)
    delta = jnp.take_along_axis(hdl, cls[:, None, :], axis=1)[:, 0, :]
    angle = jnp.mod(cls.astype(f32) * ANGLE_PER_BIN + delta, TWO_PI)

    xyz_t = jnp.transpose(voted_xyz, (0, 2, 1))      # (B, 3, N)
    boxes = jnp.concatenate([xyz_t - box[:, 0:3, :], xyz_t + box[:, 3:6, :]],
                            axis=1)
    boxes = jnp.transpose(boxes, (0, 2, 1))          # (B, N, 6)
    return score, boxes, angle, ctr


if __name__ == "__main__":
    B, N, C, H = 2, 256, 64, 128

    key = jax.random.PRNGKey(0)
    k_xyz, k_feat, k_par = jax.random.split(key, 3)
    voted_xyz = jax.random.uniform(k_xyz, (B, N, 3), jnp.float32, -2.0, 2.0)
    # Producer-side bf16 features (PyTorch NCW layout); halves feature HBM read.
    voted_features = jax.random.normal(
        k_feat, (B, C, N), jnp.float32).astype(jnp.bfloat16)
    params = init_params(k_par, C, H)

    proposals, losses, raw = voting_rpn_forward(voted_xyz, voted_features, params)
    jax.block_until_ready(raw)

    scores, boxes, angles, ctr = raw
    r_scores, r_boxes, r_angles, r_ctr = ref_forward(voted_xyz, voted_features, params)

    # bf16 matmul operands -> relaxed tolerances (same cast discipline in ref).
    assert np.allclose(np.asarray(scores), np.asarray(r_scores), atol=1e-2, rtol=1e-2)
    assert np.allclose(np.asarray(boxes), np.asarray(r_boxes), atol=1e-2, rtol=1e-2)
    assert np.allclose(np.asarray(ctr), np.asarray(r_ctr), atol=1e-2, rtol=1e-2)
    # circular comparison for angles (robust to the 0 / 2*pi wrap)
    d = np.abs(np.asarray(angles) - np.asarray(r_angles))
    d = np.minimum(d, TWO_PI - d)
    assert np.all(d < 2e-2)
    assert len(proposals) == B and losses == {}

    print("KERNEL_OK")
</pallas_src>

<mosaic_0001>
module attributes {stable_mosaic.version = 11 : i64} {
  func.func @_rpn_kernel(%arg0: i32, %arg1: i32, %arg2: memref<1x3x256xf32, #tpu.memory_space<vmem>>, %arg3: memref<1x64x256xbf16, #tpu.memory_space<vmem>>, %arg4: memref<128x64xbf16, #tpu.memory_space<vmem>>, %arg5: memref<128x128xbf16, #tpu.memory_space<vmem>>, %arg6: memref<48x128xbf16, #tpu.memory_space<vmem>>, %arg7: memref<128x2xf32, #tpu.memory_space<vmem>>, %arg8: memref<48x1xf32, #tpu.memory_space<vmem>>, %arg9: memref<1x8x256xf32, #tpu.memory_space<vmem>>, %arg10: memref<1x1x256xf32, #tpu.memory_space<vmem>>) attributes {dimension_semantics = [#tpu.dimension_semantics<parallel>, #tpu.dimension_semantics<parallel>], iteration_bounds = array<i64: 2, 1>, scalar_prefetch = 0 : i64, scratch_operands = 0 : i64, tpu.core_type = #tpu.core_type<tc>, window_params = [{transform_indices = @transform_0, window_bounds = array<i64: 1, 3, 256>}, {transform_indices = @transform_1, window_bounds = array<i64: 1, 64, 256>}, {pipeline_mode = #tpu.pipeline_mode<synchronous>, transform_indices = @transform_2, window_bounds = array<i64: 128, 64>}, {pipeline_mode = #tpu.pipeline_mode<synchronous>, transform_indices = @transform_3, window_bounds = array<i64: 128, 128>}, {pipeline_mode = #tpu.pipeline_mode<synchronous>, transform_indices = @transform_4, window_bounds = array<i64: 48, 128>}, {pipeline_mode = #tpu.pipeline_mode<synchronous>, transform_indices = @transform_5, window_bounds = array<i64: 128, 2>}, {pipeline_mode = #tpu.pipeline_mode<synchronous>, transform_indices = @transform_6, window_bounds = array<i64: 48, 1>}, {transform_indices = @transform_7, window_bounds = array<i64: 1, 8, 256>}, {transform_indices = @transform_8, window_bounds = array<i64: 1, 1, 256>}]} {
    %c0 = arith.constant 0 : index
    %c0_0 = arith.constant 0 : index
    %c0_1 = arith.constant 0 : index
    %0 = vector.load %arg3[%c0, %c0_0, %c0_1] : memref<1x64x256xbf16, #tpu.memory_space<vmem>>, vector<1x64x256xbf16>
    %1 = vector.shape_cast %0 : vector<1x64x256xbf16> to vector<64x256xbf16>
    %c0_2 = arith.constant 0 : index
    %c0_3 = arith.constant 0 : index
    %c0_4 = arith.constant 0 : index
    %2 = vector.load %arg2[%c0_2, %c0_3, %c0_4] : memref<1x3x256xf32, #tpu.memory_space<vmem>>, vector<1x3x256xf32>
    %3 = vector.shape_cast %2 : vector<1x3x256xf32> to vector<3x256xf32>
    %c0_5 = arith.constant 0 : index
    %c0_6 = arith.constant 0 : index
    %4 = vector.load %arg7[%c0_5, %c0_6] : memref<128x2xf32, #tpu.memory_space<vmem>>, vector<128x1xf32>
    %c0_7 = arith.constant 0 : index
    %c1 = arith.constant 1 : index
    %5 = vector.load %arg7[%c0_7, %c1] : memref<128x2xf32, #tpu.memory_space<vmem>>, vector<128x1xf32>
    %c0_8 = arith.constant 0 : index
    %c0_9 = arith.constant 0 : index
    %6 = vector.load %arg4[%c0_8, %c0_9] : memref<128x64xbf16, #tpu.memory_space<vmem>>, vector<128x64xbf16>
    %cst = arith.constant dense<0.000000e+00> : vector<128x256xf32>
    %7 = tpu.matmul %6, %1, %cst {dimension_numbers = #tpu.dot_dimension_numbers<[1], [0], [0], [1], [0, 0, 1, 1], [], []>} : vector<128x64xbf16>, vector<64x256xbf16>, vector<128x256xf32> -> vector<128x256xf32>
    %8 = vector.broadcast %4 : vector<128x1xf32> to vector<128x256xf32>
    %9 = arith.addf %7, %8 : vector<128x256xf32>
    %cst_10 = arith.constant 0.000000e+00 : f32
    %10 = vector.broadcast %cst_10 : f32 to vector<128x256xf32>
    %11 = arith.maximumf %9, %10 : vector<128x256xf32>
    %c0_11 = arith.constant 0 : index
    %c0_12 = arith.constant 0 : index
    %12 = vector.load %arg5[%c0_11, %c0_12] : memref<128x128xbf16, #tpu.memory_space<vmem>>, vector<128x128xbf16>
    %13 = arith.truncf %11 : vector<128x256xf32> to vector<128x256xbf16>
    %cst_13 = arith.constant dense<0.000000e+00> : vector<128x256xf32>
    %14 = tpu.matmul %12, %13, %cst_13 {dimension_numbers = #tpu.dot_dimension_numbers<[1], [0], [0], [1], [0, 0, 1, 1], [], []>} : vector<128x128xbf16>, vector<128x256xbf16>, vector<128x256xf32> -> vector<128x256xf32>
    %15 = vector.broadcast %5 : vector<128x1xf32> to vector<128x256xf32>
    %16 = arith.addf %14, %15 : vector<128x256xf32>
    %cst_14 = arith.constant 0.000000e+00 : f32
    %17 = vector.broadcast %cst_14 : f32 to vector<128x256xf32>
    %18 = arith.maximumf %16, %17 : vector<128x256xf32>
    %c0_15 = arith.constant 0 : index
    %c0_16 = arith.constant 0 : index
    %19 = vector.load %arg6[%c0_15, %c0_16] : memref<48x128xbf16, #tpu.memory_space<vmem>>, vector<48x128xbf16>
    %20 = arith.truncf %18 : vector<128x256xf32> to vector<128x256xbf16>
    %cst_17 = arith.constant dense<0.000000e+00> : vector<48x256xf32>
    %21 = tpu.matmul %19, %20, %cst_17 {dimension_numbers = #tpu.dot_dimension_numbers<[1], [0], [0], [1], [0, 0, 1, 1], [], []>} : vector<48x128xbf16>, vector<128x256xbf16>, vector<48x256xf32> -> vector<48x256xf32>
    %c0_18 = arith.constant 0 : index
    %c0_19 = arith.constant 0 : index
    %22 = vector.load %arg8[%c0_18, %c0_19] : memref<48x1xf32, #tpu.memory_space<vmem>>, vector<48x1xf32>
    %23 = vector.broadcast %22 : vector<48x1xf32> to vector<48x256xf32>
    %24 = arith.addf %21, %23 : vector<48x256xf32>
    %25 = vector.extract_strided_slice %24 {offsets = [33, 0], sizes = [1, 256], strides = [1, 1]} : vector<48x256xf32> to vector<1x256xf32>
    %26 = vector.extract_strided_slice %24 {offsets = [32, 0], sizes = [1, 256], strides = [1, 1]} : vector<48x256xf32> to vector<1x256xf32>
    %27 = arith.subf %25, %26 : vector<1x256xf32>
    %28 = arith.negf %27 : vector<1x256xf32>
    %29 = math.exp %28 : vector<1x256xf32>
    %cst_20 = arith.constant 1.000000e+00 : f32
    %30 = vector.broadcast %cst_20 : f32 to vector<1x256xf32>
    %31 = arith.addf %30, %29 : vector<1x256xf32>
    %32 = arith.divf %30, %31 : vector<1x256xf32>
    %33 = vector.extract_strided_slice %24 {offsets = [34, 0], sizes = [6, 256], strides = [1, 1]} : vector<48x256xf32> to vector<6x256xf32>
    %34 = vector.extract_strided_slice %33 {offsets = [0, 0], sizes = [3, 256], strides = [1, 1]} : vector<6x256xf32> to vector<3x256xf32>
    %35 = arith.subf %3, %34 : vector<3x256xf32>
    %36 = vector.extract_strided_slice %33 {offsets = [3, 0], sizes = [3, 256], strides = [1, 1]} : vector<6x256xf32> to vector<3x256xf32>
    %37 = arith.addf %3, %36 : vector<3x256xf32>
    %38 = vector.extract_strided_slice %24 {offsets = [40, 0], sizes = [1, 256], strides = [1, 1]} : vector<48x256xf32> to vector<1x256xf32>
    %39 = vector.extract_strided_slice %24 {offsets = [0, 0], sizes = [1, 256], strides = [1, 1]} : vector<48x256xf32> to vector<1x256xf32>
    %cst_21 = arith.constant 0.000000e+00 : f32
    %40 = vector.broadcast %cst_21 : f32 to vector<1x256xf32>
    %41 = vector.extract_strided_slice %24 {offsets = [16, 0], sizes = [1, 256], strides = [1, 1]} : vector<48x256xf32> to vector<1x256xf32>
    %42 = vector.extract_strided_slice %24 {offsets = [1, 0], sizes = [1, 256], strides = [1, 1]} : vector<48x256xf32> to vector<1x256xf32>
    %43 = vector.extract_strided_slice %24 {offsets = [17, 0], sizes = [1, 256], strides = [1, 1]} : vector<48x256xf32> to vector<1x256xf32>
    %44 = arith.cmpf ogt, %42, %39 : vector<1x256xf32>
    %45 = arith.select %44, %42, %39 : vector<1x256xi1>, vector<1x256xf32>
    %cst_22 = arith.constant 0.52359879 : f32
    %46 = vector.broadcast %cst_22 : f32 to vector<1x256xf32>
    %47 = arith.select %44, %46, %40 : vector<1x256xi1>, vector<1x256xf32>
    %48 = arith.select %44, %43, %41 : vector<1x256xi1>, vector<1x256xf32>
    %49 = vector.extract_strided_slice %24 {offsets = [2, 0], sizes = [1, 256], strides = [1, 1]} : vector<48x256xf32> to vector<1x256xf32>
    %50 = vector.extract_strided_slice %24 {offsets = [18, 0], sizes = [1, 256], strides = [1, 1]} : vector<48x256xf32> to vector<1x256xf32>
    %51 = arith.cmpf ogt, %49, %45 : vector<1x256xf32>
    %52 = arith.select %51, %49, %45 : vector<1x256xi1>, vector<1x256xf32>
    %cst_23 = arith.constant 1.04719758 : f32
    %53 = vector.broadcast %cst_23 : f32 to vector<1x256xf32>
    %54 = arith.select %51, %53, %47 : vector<1x256xi1>, vector<1x256xf32>
    %55 = arith.select %51, %50, %48 : vector<1x256xi1>, vector<1x256xf32>
    %56 = vector.extract_strided_slice %24 {offsets = [3, 0], sizes = [1, 256], strides = [1, 1]} : vector<48x256xf32> to vector<1x256xf32>
    %57 = vector.extract_strided_slice %24 {offsets = [19, 0], sizes = [1, 256], strides = [1, 1]} : vector<48x256xf32> to vector<1x256xf32>
    %58 = arith.cmpf ogt, %56, %52 : vector<1x256xf32>
    %59 = arith.select %58, %56, %52 : vector<1x256xi1>, vector<1x256xf32>
    %cst_24 = arith.constant 1.57079637 : f32
    %60 = vector.broadcast %cst_24 : f32 to vector<1x256xf32>
    %61 = arith.select %58, %60, %54 : vector<1x256xi1>, vector<1x256xf32>
    %62 = arith.select %58, %57, %55 : vector<1x256xi1>, vector<1x256xf32>
    %63 = vector.extract_strided_slice %24 {offsets = [4, 0], sizes = [1, 256], strides = [1, 1]} : vector<48x256xf32> to vector<1x256xf32>
    %64 = vector.extract_strided_slice %24 {offsets = [20, 0], sizes = [1, 256], strides = [1, 1]} : vector<48x256xf32> to vector<1x256xf32>
    %65 = arith.cmpf ogt, %63, %59 : vector<1x256xf32>
    %66 = arith.select %65, %63, %59 : vector<1x256xi1>, vector<1x256xf32>
    %cst_25 = arith.constant 2.09439516 : f32
    %67 = vector.broadcast %cst_25 : f32 to vector<1x256xf32>
    %68 = arith.select %65, %67, %61 : vector<1x256xi1>, vector<1x256xf32>
    %69 = arith.select %65, %64, %62 : vector<1x256xi1>, vector<1x256xf32>
    %70 = vector.extract_strided_slice %24 {offsets = [5, 0], sizes = [1, 256], strides = [1, 1]} : vector<48x256xf32> to vector<1x256xf32>
    %71 = vector.extract_strided_slice %24 {offsets = [21, 0], sizes = [1, 256], strides = [1, 1]} : vector<48x256xf32> to vector<1x256xf32>
    %72 = arith.cmpf ogt, %70, %66 : vector<1x256xf32>
    %73 = arith.select %72, %70, %66 : vector<1x256xi1>, vector<1x256xf32>
    %cst_26 = arith.constant 2.61799383 : f32
    %74 = vector.broadcast %cst_26 : f32 to vector<1x256xf32>
    %75 = arith.select %72, %74, %68 : vector<1x256xi1>, vector<1x256xf32>
    %76 = arith.select %72, %71, %69 : vector<1x256xi1>, vector<1x256xf32>
    %77 = vector.extract_strided_slice %24 {offsets = [6, 0], sizes = [1, 256], strides = [1, 1]} : vector<48x256xf32> to vector<1x256xf32>
    %78 = vector.extract_strided_slice %24 {offsets = [22, 0], sizes = [1, 256], strides = [1, 1]} : vector<48x256xf32> to vector<1x256xf32>
    %79 = arith.cmpf ogt, %77, %73 : vector<1x256xf32>
    %80 = arith.select %79, %77, %73 : vector<1x256xi1>, vector<1x256xf32>
    %cst_27 = arith.constant 3.14159274 : f32
    %81 = vector.broadcast %cst_27 : f32 to vector<1x256xf32>
    %82 = arith.select %79, %81, %75 : vector<1x256xi1>, vector<1x256xf32>
    %83 = arith.select %79, %78, %76 : vector<1x256xi1>, vector<1x256xf32>
    %84 = vector.extract_strided_slice %24 {offsets = [7, 0], sizes = [1, 256], strides = [1, 1]} : vector<48x256xf32> to vector<1x256xf32>
    %85 = vector.extract_strided_slice %24 {offsets = [23, 0], sizes = [1, 256], strides = [1, 1]} : vector<48x256xf32> to vector<1x256xf32>
    %86 = arith.cmpf ogt, %84, %80 : vector<1x256xf32>
    %87 = arith.select %86, %84, %80 : vector<1x256xi1>, vector<1x256xf32>
    %cst_28 = arith.constant 3.66519141 : f32
    %88 = vector.broadcast %cst_28 : f32 to vector<1x256xf32>
    %89 = arith.select %86, %88, %82 : vector<1x256xi1>, vector<1x256xf32>
    %90 = arith.select %86, %85, %83 : vector<1x256xi1>, vector<1x256xf32>
    %91 = vector.extract_strided_slice %24 {offsets = [8, 0], sizes = [1, 256], strides = [1, 1]} : vector<48x256xf32> to vector<1x256xf32>
    %92 = vector.extract_strided_slice %24 {offsets = [24, 0], sizes = [1, 256], strides = [1, 1]} : vector<48x256xf32> to vector<1x256xf32>
    %93 = arith.cmpf ogt, %91, %87 : vector<1x256xf32>
    %94 = arith.select %93, %91, %87 : vector<1x256xi1>, vector<1x256xf32>
    %cst_29 = arith.constant 4.18879032 : f32
    %95 = vector.broadcast %cst_29 : f32 to vector<1x256xf32>
    %96 = arith.select %93, %95, %89 : vector<1x256xi1>, vector<1x256xf32>
    %97 = arith.select %93, %92, %90 : vector<1x256xi1>, vector<1x256xf32>
    %98 = vector.extract_strided_slice %24 {offsets = [9, 0], sizes = [1, 256], strides = [1, 1]} : vector<48x256xf32> to vector<1x256xf32>
    %99 = vector.extract_strided_slice %24 {offsets = [25, 0], sizes = [1, 256], strides = [1, 1]} : vector<48x256xf32> to vector<1x256xf32>
    %100 = arith.cmpf ogt, %98, %94 : vector<1x256xf32>
    %101 = arith.select %100, %98, %94 : vector<1x256xi1>, vector<1x256xf32>
    %cst_30 = arith.constant 4.71238899 : f32
    %102 = vector.broadcast %cst_30 : f32 to vector<1x256xf32>
    %103 = arith.select %100, %102, %96 : vector<1x256xi1>, vector<1x256xf32>
    %104 = arith.select %100, %99, %97 : vector<1x256xi1>, vector<1x256xf32>
    %105 = vector.extract_strided_slice %24 {offsets = [10, 0], sizes = [1, 256], strides = [1, 1]} : vector<48x256xf32> to vector<1x256xf32>
    %106 = vector.extract_strided_slice %24 {offsets = [26, 0], sizes = [1, 256], strides = [1, 1]} : vector<48x256xf32> to vector<1x256xf32>
    %107 = arith.cmpf ogt, %105, %101 : vector<1x256xf32>
    %108 = arith.select %107, %105, %101 : vector<1x256xi1>, vector<1x256xf32>
    %cst_31 = arith.constant 5.23598766 : f32
    %109 = vector.broadcast %cst_31 : f32 to vector<1x256xf32>
    %110 = arith.select %107, %109, %103 : vector<1x256xi1>, vector<1x256xf32>
    %111 = arith.select %107, %106, %104 : vector<1x256xi1>, vector<1x256xf32>
    %112 = vector.extract_strided_slice %24 {offsets = [11, 0], sizes = [1, 256], strides = [1, 1]} : vector<48x256xf32> to vector<1x256xf32>
    %113 = vector.extract_strided_slice %24 {offsets = [27, 0], sizes = [1, 256], strides = [1, 1]} : vector<48x256xf32> to vector<1x256xf32>
    %114 = arith.cmpf ogt, %112, %108 : vector<1x256xf32>
    %cst_32 = arith.constant 5.75958633 : f32
    %115 = vector.broadcast %cst_32 : f32 to vector<1x256xf32>
    %116 = arith.select %114, %115, %110 : vector<1x256xi1>, vector<1x256xf32>
    %117 = arith.select %114, %113, %111 : vector<1x256xi1>, vector<1x256xf32>
    %118 = arith.addf %116, %117 : vector<1x256xf32>
    %cst_33 = arith.constant 6.28318548 : f32
    %119 = vector.broadcast %cst_33 : f32 to vector<1x256xf32>
    %120 = arith.remf %118, %119 : vector<1x256xf32>
    %cst_34 = arith.constant 0.000000e+00 : f32
    %121 = vector.broadcast %cst_34 : f32 to vector<1x256xf32>
    %122 = arith.cmpf one, %120, %121 : vector<1x256xf32>
    %cst_35 = arith.constant 0.000000e+00 : f32
    %123 = vector.broadcast %cst_35 : f32 to vector<1x256xf32>
    %124 = arith.cmpf olt, %120, %123 : vector<1x256xf32>
    %cst_36 = arith.constant 0.000000e+00 : f32
    %125 = arith.cmpf olt, %cst_33, %cst_36 : f32
    %126 = vector.broadcast %125 : i1 to vector<1x256xi1>
    %127 = vector.broadcast %126 : vector<1x256xi1> to vector<1x256xi1>
    %128 = arith.xori %124, %127 : vector<1x256xi1>
    %129 = arith.andi %128, %122 : vector<1x256xi1>
    %130 = vector.broadcast %cst_33 : f32 to vector<1x256xf32>
    %131 = arith.addf %120, %130 : vector<1x256xf32>
    %132 = arith.select %129, %131, %120 : vector<1x256xi1>, vector<1x256xf32>
    %133 = tpu.concatenate %32, %35, %37, %132 in 0 : vector<1x256xf32>, vector<3x256xf32>, vector<3x256xf32>, vector<1x256xf32> -> vector<8x256xf32>
    %c0_37 = arith.constant 0 : index
    %c0_38 = arith.constant 0 : index
    %c0_39 = arith.constant 0 : index
    %134 = vector.load %arg9[%c0_37, %c0_38, %c0_39] : memref<1x8x256xf32, #tpu.memory_space<vmem>>, vector<1x8x256xf32>
    %135 = vector.shape_cast %134 : vector<1x8x256xf32> to vector<8x256xf32>
    %136 = vector.shape_cast %133 : vector<8x256xf32> to vector<1x8x256xf32>
    tpu.vector_store %arg9[%c0_37, %c0_38, %c0_39], %136 {strides = array<i32>} : memref<1x8x256xf32, #tpu.memory_space<vmem>>, vector<1x8x256xf32>,
    %c0_40 = arith.constant 0 : index
    %c0_41 = arith.constant 0 : index
    %c0_42 = arith.constant 0 : index
    %137 = vector.load %arg10[%c0_40, %c0_41, %c0_42] : memref<1x1x256xf32, #tpu.memory_space<vmem>>, vector<1x1x256xf32>
    %138 = vector.shape_cast %137 : vector<1x1x256xf32> to vector<1x256xf32>
    %139 = vector.shape_cast %38 : vector<1x256xf32> to vector<1x1x256xf32>
    tpu.vector_store %arg10[%c0_40, %c0_41, %c0_42], %139 {strides = array<i32>} : memref<1x1x256xf32, #tpu.memory_space<vmem>>, vector<1x1x256xf32>,
    return
  }
  func.func @transform_0(%arg0: i32, %arg1: i32) -> (i32, i32, i32) {
    %c0_i32 = arith.constant 0 : i32
    %c0_i32_0 = arith.constant 0 : i32
    return %arg0, %c0_i32, %arg1 : i32, i32, i32
  }
  func.func @transform_1(%arg0: i32, %arg1: i32) -> (i32, i32, i32) {
    %c0_i32 = arith.constant 0 : i32
    %c0_i32_0 = arith.constant 0 : i32
    return %arg0, %c0_i32, %arg1 : i32, i32, i32
  }
  func.func @transform_2(%arg0: i32, %arg1: i32) -> (i32, i32) {
    %c0_i32 = arith.constant 0 : i32
    %c0_i32_0 = arith.constant 0 : i32
    %c0_i32_1 = arith.constant 0 : i32
    return %c0_i32, %c0_i32_0 : i32, i32
  }
  func.func @transform_3(%arg0: i32, %arg1: i32) -> (i32, i32) {
    %c0_i32 = arith.constant 0 : i32
    %c0_i32_0 = arith.constant 0 : i32
    %c0_i32_1 = arith.constant 0 : i32
    return %c0_i32, %c0_i32_0 : i32, i32
  }
  func.func @transform_4(%arg0: i32, %arg1: i32) -> (i32, i32) {
    %c0_i32 = arith.constant 0 : i32
    %c0_i32_0 = arith.constant 0 : i32
    %c0_i32_1 = arith.constant 0 : i32
    return %c0_i32, %c0_i32_0 : i32, i32
  }
  func.func @transform_5(%arg0: i32, %arg1: i32) -> (i32, i32) {
    %c0_i32 = arith.constant 0 : i32
    %c0_i32_0 = arith.constant 0 : i32
    %c0_i32_1 = arith.constant 0 : i32
    return %c0_i32, %c0_i32_0 : i32, i32
  }
  func.func @transform_6(%arg0: i32, %arg1: i32) -> (i32, i32) {
    %c0_i32 = arith.constant 0 : i32
    %c0_i32_0 = arith.constant 0 : i32
    %c0_i32_1 = arith.constant 0 : i32
    return %c0_i32, %c0_i32_0 : i32, i32
  }
  func.func @transform_7(%arg0: i32, %arg1: i32) -> (i32, i32, i32) {
    %c0_i32 = arith.constant 0 : i32
    %c0_i32_0 = arith.constant 0 : i32
    return %arg0, %c0_i32, %arg1 : i32, i32, i32
  }
  func.func @transform_8(%arg0: i32, %arg1: i32) -> (i32, i32, i32) {
    %c0_i32 = arith.constant 0 : i32
    %c0_i32_0 = arith.constant 0 : i32
    return %arg0, %c0_i32, %arg1 : i32, i32, i32
  }
}

</mosaic_0001>

<bundles_post_ra>
// kernel: tpu_custom_call.1
= control target key start
LH: loop header
LB: loop body
LE: loop exit
PB: predicated region body
PF: predicated region fallthrough
CT: control target
= control target key end

     0   :  { %14 = vsyncpa [#allocation3], 0  ;;  %s2674_s0 = inlined_call_operand.vmem [shape: f32[2,3,256], index: 0, kind: input, shape index: {}]   ;;  %s2675_s1 = inlined_call_operand.vmem [shape: bf16[2,64,256], index: 1, kind: input, shape index: {}]   ;;  %s2676_s2 = inlined_call_operand.vmem [shape: bf16[128,64], index: 2, kind: input, shape index: {}]   ;;  %s2677_s3 = inlined_call_operand.vmem [shape: bf16[128,128], index: 3, kind: input, shape index: {}]   ;;  %s2678_s4 = inlined_call_operand.vmem [shape: bf16[48,128], index: 4, kind: input, shape index: {}]   ;;  %s2679_s5 = inlined_call_operand.vmem [shape: f32[128,2], index: 5, kind: input, shape index: {}]   ;;  %s2680_s6 = inlined_call_operand.vmem [shape: f32[48,1], index: 6, kind: input, shape index: {}]   ;;  %s2681_s7 = inlined_call_operand.hbm [shape: f32[2,8,256], index: 7, kind: output, shape index: {0}]   ;;  %s2682_s8 = inlined_call_operand.hbm [shape: f32[2,1,256], index: 8, kind: output, shape index: {1}]  }
   0x1   :  { %16 = vsyncpa [#allocation3 + $0x1], 0 }
   0x2   :  { %17 = vsyncpa [#allocation5], 0 }
   0x3   :  { %19 = vsyncpa [#allocation5 + $0x1], 0  ;;  %s2088_s27 = smov 0   ;;  %s2090_s28 = smov 0  }
   0x4   :  { %s2092_s29 = smov 0   ;;  %s2094_s30 = smov 0  }
   0x5   :  { %s2096_s9 = smov 0   ;;  %s2098_s10 = smov 0  }
   0x6 LB: > { %s1754_s11 = sadd.s32 4294967295, %s2035_s10   ;;  %s1755_s12 = sadd.s32 4294967294, %s2035_s10   ;;  %s2035_s10 = sphi %s2098_s10, %s25_s10   ;;  %s2031_s9 = sphi %s2096_s9, %s2707_s9   ;;  %s2027_s30 = sphi %s2094_s30, %s2706_s30   ;;  %s2023_s29 = sphi %s2092_s29, %s2705_s29   ;;  %s2019_s28 = sphi %s2090_s28, %s2704_s28   ;;  %s2015_s27 = sphi %s2088_s27, %s2703_s27  }
   0x7   : > { %s37_s13 = sadd.s32 1, %s2031_s9  ;;  %s207_s14 = sadd.s32 1, %s2023_s29 }
   0x8   : > { %p39_p0 = scmp.ge.s32.totalorder %s37_s13, 2  ;;  %p217_p1 = scmp.ne.s32.totalorder %s2023_s29, %s2019_s28 }
   0x9   : > { %p218_p2 = scmp.eq.s32.totalorder %s1754_s11, 1  ;;  %p223_p3 = scmp.ne.s32.totalorder %s2019_s28, %s2015_s27 }
   0xa   : > { %s2709_s13 = smov (%p39_p0, %s37_s13), 0  ;;  %p224_p5 = scmp.eq.s32.totalorder %s1755_s12, 1 }
   0xb   : > { %p2128_p4 = por %p218_p2, %p217_p1  ;;  %s202_s16 = ssub.s32 %s2031_s9, %s2709_s13 }
   0xc   : > { %p1758_p6 = scmp.ge.s32.totalorder %s2035_s10, 1  ;;  %p205_p7 = scmp.eq.s32.totalorder %s202_s16, 0 }
   0xd   : > { %p2135_p8 = por %p224_p5, %p223_p3  ;;  %p311_p9 = scmp.lt.s32.totalorder %s2035_s10, 3 }
   0xe   : > { %s2141_s18 = scalar_select %p205_p7, %s2023_s29, %s207_s14  }
   0xf   : > { %p312_p10 = pnand %p1758_p6, %p311_p9 }
  0x10   : > { %p364_p11 = scmp.lt.s32.totalorder (!%p312_p10), %s2027_s30, 1  ;;  %v2037_v0 = vmov (!%p312_p10), 0   ;;  %v2158_v7 = vld [vmem:[%s2679_s5] sm:$0xff] (!%p312_p10)  ;;  %v2164_v9 = vld [vmem:[%s2679_s5 + $0x10] sm:$0xff] (!%p312_p10)  ;;  %v2169_v10 = vld [vmem:[%s2679_s5 + $0x8] sm:$0xff] (!%p312_p10)  ;;  %vm587_vm0 = vcmask (!%p312_p10), 523264  }
  0x11   : > { %315 = sbr.rel (%p312_p10) target bundleno = 920 (0x398), region = 48  ;;  %644 = vmatprep.mubr.bf16.mxu0 (!%p312_p10), %v2037_v0  ;;  %1880 = vset.pattern.permute.xlu0 (!%p312_p10), %v2037_v0  ;;  %v2175_v11 = vld [vmem:[%s2679_s5 + $0x18] sm:$0xff] (!%p312_p10)  ;;  %v1898_v13 = vld [vmem:[%s2676_s2] sm:$0xff] (!%p312_p10)   ;;  %v2189_v15 = vld [vmem:[%s2679_s5 + $0x28] sm:$0xff] (!%p312_p10)  ;;  %v2038_v34 = vmov (!%p312_p10), 1   ;;  %s2566_s21 = sand.u32 (!%p312_p10), 1, %s2019_s28  }
  0x12   : > { %1881 = vset.pattern.permute.xlu1 (!%p312_p10), %v2037_v0  ;;  %933 = vmatprep.mubr.bf16.mxu1 (!%p312_p10), %v2037_v0  ;;  %v2184_v14 = vld [vmem:[%s2679_s5 + $0x20] sm:$0xff] (!%p312_p10)  ;;  %v2195_v16 = vld [vmem:[%s2679_s5 + $0x30] sm:$0xff] (!%p312_p10)  ;;  %v2201_v17 = vld [vmem:[%s2679_s5 + $0x38] sm:$0xff] (!%p312_p10)  ;;  %s1760_s22 = sshll.u32 (!%p312_p10), %s2566_s21, 1  ;;  %s1815_s24 = sshll.u32 (!%p312_p10), %s2027_s30, 5 }
  0x13   : > { %429 = vperm.xlu0 (!%p312_p10), %1880, %v2158_v7   ;;  %439 = vperm.xlu1 (!%p312_p10), %1881, %v2164_v9   ;;  %v2211_v18 = vld [vmem:[%s2679_s5 + $0x40] sm:$0xff] (!%p312_p10)  ;;  %v1899_v19 = vld [vmem:[%s2676_s2 + $0x8] sm:$0xff] (!%p312_p10)   ;;  %v2226_v21 = vld [vmem:[%s2679_s5 + $0x50] sm:$0xff] (!%p312_p10)  ;;  %s362_s25 = scalar_lea.vmem (!%p312_p10), [#allocation4], %s1760_s22  ;;  %s2587_s12 = scalar_lea.hbm (!%p312_p10), %s2682_s8, %s1815_s24 }
  0x14   : > { %v2219_v20 = vld [vmem:[%s2679_s5 + $0x48] sm:$0xff] (!%p312_p10)  ;;  %v2232_v22 = vld [vmem:[%s2679_s5 + $0x58] sm:$0xff] (!%p312_p10)  ;;  %v2240_v23 = vld [vmem:[%s2679_s5 + $0x60] sm:$0xff] (!%p312_p10)  ;;  %s1625_s26 = sshll.u32 (!%p312_p10), %s362_s25, 4  ;;  %s2041_s16 = smov (!%p312_p10), [#allocation4]   ;;  %s2589_s26 = int_to_ptr.vmem [resolvable:$true] %s1625_s26 }
  0x15   : > { %v1900_v24 = vld [vmem:[%s2676_s2 + $0x10] sm:$0xff] (!%p312_p10)   ;;  %v2248_v25 = vld [vmem:[%s2679_s5 + $0x68] sm:$0xff] (!%p312_p10)  ;;  %v2261_v27 = vld [vmem:[%s2679_s5 + $0x78] sm:$0xff] (!%p312_p10) }
  0x16   : > { %v2255_v26 = vld [vmem:[%s2679_s5 + $0x70] sm:$0xff] (!%p312_p10)  ;;  %v1901_v28 = vld [vmem:[%s2676_s2 + $0x18] sm:$0xff] (!%p312_p10)   ;;  %v1902_v29 = vld [vmem:[%s2676_s2 + $0x20] sm:$0xff] (!%p312_p10)  }
  0x17   : > { %434 = vperm.xlu0 (!%p312_p10), %1880, %v2169_v10   ;;  %444 = vperm.xlu1 (!%p312_p10), %1881, %v2175_v11   ;;  %v1903_v30 = vld [vmem:[%s2676_s2 + $0x28] sm:$0xff] (!%p312_p10)   ;;  %v1904_v31 = vld [vmem:[%s2676_s2 + $0x30] sm:$0xff] (!%p312_p10)   ;;  %v1905_v32 = vld [vmem:[%s2676_s2 + $0x38] sm:$0xff] (!%p312_p10)  }
  0x18   : > { %s2147_s19 = scalar_select %p364_p11, %s2027_s30, 1 }
  0x1a   : > { %s1813_s20 = sshll.u32 %s2147_s19, 6  ;;  %s1812_s14 = sshll.u32 %s2147_s19, 3 }
  0x1b   : > { %s381_s23 = scalar_lea.vmem %s2675_s1, %s1813_s20  ;;  %449 = vperm.xlu0 %1880, %v2184_v14   ;;  %454 = vperm.xlu1 %1881, %v2189_v15   ;;  %s371_s20 = scalar_lea.vmem %s2674_s0, %s1812_s14 }
  0x1c   : > { %v1886_v1 = vld [vmem:[%s381_s23 + $0x4] ss:$8 sps:$4 sm:$0xff]   ;;  %v1888_v2 = vld [vmem:[%s381_s23] ss:$8 sps:$4 sm:$0xff]   ;;  %v1889_v3 = vld [vmem:[%s381_s23 + $0x14] ss:$8 sps:$4 sm:$0xff]  }
  0x1d   : > { %612 = vmatprep.subr.bf16.mxu0 %v1886_v1  ;;  %v1891_v4 = vld [vmem:[%s381_s23 + $0x10] ss:$8 sps:$4 sm:$0xff]   ;;  %v1892_v5 = vld [vmem:[%s381_s23 + $0x24] ss:$8 sps:$4 sm:$0xff]   ;;  %v1894_v6 = vld [vmem:[%s381_s23 + $0x20] ss:$8 sps:$4 sm:$0xff]  }
  0x1e   : > { %613 = vmatpush1.bf16.msra.mxu0 %v1888_v2  ;;  %v1895_v8 = vld [vmem:[%s381_s23 + $0x34] ss:$8 sps:$4 sm:$0xff]   ;;  %v1897_v12 = vld [vmem:[%s381_s23 + $0x30] ss:$8 sps:$4 sm:$0xff]   ;;  %s1593_s14 = scalar_lea.sflag [#allocation5], %s2566_s21  ;;  %s1925_s19 = scalar_lea.vmem %s2589_s26, 32 }
  0x1f   : > { %614 = vmatprep.subr.bf16.mxu0 %v1889_v3  ;;  %459 = vperm.xlu0 %1880, %v2195_v16   ;;  %p1926_p12 = scmp.ne.s32.totalorder %s2589_s26, %s1925_s19 }
  0x20   : > { %464 = vperm.xlu1 %1881, %v2201_v17  }
  0x21   : > { %p1927_p13 = pnand %p1926_p12, %p2128_p4 }
  0x22   : > { %615 = vmatpush1.bf16.msra.mxu0 %v1891_v4 }
  0x23   : > { %616 = vmatprep.subr.bf16.mxu0 %v1892_v5  ;;  %469 = vperm.xlu0 %1880, %v2211_v18   ;;  %p1928_p0 = pneg %p1927_p13 }
  0x24   : > { %474 = vperm.xlu1 %1881, %v2219_v20  }
  0x26   : > { %617 = vmatpush1.bf16.msra.mxu0 %v1894_v6 }
  0x27   : > { %618 = vmatprep.subr.bf16.mxu0 %v1895_v8  ;;  %479 = vperm.xlu0 %1880, %v2226_v21  }
  0x28   : > { %484 = vperm.xlu1 %1881, %v2232_v22  }
  0x2a   : > { %619 = vmatpush1.bf16.msra.mxu0 %v1897_v12 }
  0x2b   : > { %489 = vperm.xlu0 %1880, %v2240_v23  }
  0x2c   : > { %494 = vperm.xlu1 %1881, %v2248_v25  }
  0x2d   : > { %1781 = vmatmul.mubr.msk.bf16.vlgmr.msra.gmra.mrb[0].mxu0 %vm587_vm0, %v1898_v13 }
  0x2e   : > { %654 = vmatprep.mubr.bf16.mxu0 %v2037_v0 }
  0x2f   : > { %499 = vperm.xlu0 %1880, %v2255_v26  }
  0x30   : > { %504 = vperm.xlu1 %1881, %v2261_v27  }
  0x33   : > { %1882 = vset.pattern.permute.xlu0 %v2038_v34 }
  0x34   : > { %1883 = vset.pattern.permute.xlu1 %v2038_v34  ;;  %790 = vperm.xlu0 %1882, %v2158_v7  }
  0x35   : > { %1782 = vmatmul.mubr.msk.bf16.gmra.mrb[4].mxu0 %vm587_vm0, %v1899_v19  ;;  %794 = vperm.xlu1 %1883, %v2169_v10  }
  0x36   : > { %664 = vmatprep.mubr.bf16.mxu0 %v2037_v0 }
  0x38   : > { %802 = vperm.xlu0 %1882, %v2175_v11  }
  0x39   : > { %798 = vperm.xlu1 %1883, %v2164_v9  }
  0x3c   : > { %810 = vperm.xlu0 %1882, %v2189_v15  }
  0x3d   : > { %1783 = vmatmul.mubr.msk.bf16.gmra.mrb[8].mxu0 %vm587_vm0, %v1900_v24  ;;  %806 = vperm.xlu1 %1883, %v2184_v14  }
  0x3e   : > { %674 = vmatprep.mubr.bf16.mxu0 %v2037_v0 }
  0x40   : > { %818 = vperm.xlu0 %1882, %v2201_v17  }
  0x41   : > { %814 = vperm.xlu1 %1883, %v2195_v16  }
  0x44   : > { %826 = vperm.xlu0 %1882, %v2219_v20  }
  0x45   : > { %1784 = vmatmul.mubr.msk.bf16.gmra.mrb[12].mxu0 %vm587_vm0, %v1901_v28  ;;  %822 = vperm.xlu1 %1883, %v2211_v18  }
  0x46   : > { %684 = vmatprep.mubr.bf16.mxu0 %v2037_v0 }
  0x48   : > { %834 = vperm.xlu0 %1882, %v2232_v22  }
  0x49   : > { %830 = vperm.xlu1 %1883, %v2226_v21  }
  0x4c   : > { %842 = vperm.xlu0 %1882, %v2248_v25  }
  0x4d   : > { %1785 = vmatmul.mubr.msk.bf16.gmra.mrb[16].mxu0 %vm587_vm0, %v1902_v29  ;;  %838 = vperm.xlu1 %1883, %v2240_v23  }
  0x4e   : > { %694 = vmatprep.mubr.bf16.mxu0 %v2037_v0 }
  0x50   : > { %850 = vperm.xlu0 %1882, %v2261_v27  }
  0x51   : > { %846 = vperm.xlu1 %1883, %v2255_v26  }
  0x54   : > { %1885 = vset.pattern.permute.xlu0 %v2037_v0 }
  0x55   : > { %1786 = vmatmul.mubr.msk.bf16.gmra.mrb[20].mxu0 %vm587_vm0, %v1903_v30  ;;  %1884 = vset.pattern.permute.xlu1 %v2037_v0 }
  0x56   : > { %704 = vmatprep.mubr.bf16.mxu0 %v2037_v0 }
  0x5d   : > { %1787 = vmatmul.mubr.msk.bf16.gmra.mrb[24].mxu0 %vm587_vm0, %v1904_v31 }
  0x5e   : > { %714 = vmatprep.mubr.bf16.mxu0 %v2037_v0 }
  0x65   : > { %1788 = vmatmul.mubr.msk.bf16.gmra.mrb[28].mxu0 %vm587_vm0, %v1905_v32 }
  0x66   : > { %1154 = vmatprep.mubr.bf16.mxu0 %v2037_v0 }
  0x92   : > { %v430_v33 = vpop.permute.xlu0 %429  ;;  %v440_v43 = vpop.permute.xlu1 %439 }
  0x96   : > { %v435_v36 = vpop.permute.xlu0 %434  ;;  %v445_v54 = vpop.permute.xlu1 %444 }
  0x9a   : > { %v450_v2 = vpop.permute.xlu0 %449  ;;  %v455_v7 = vpop.permute.xlu1 %454 }
  0x9e   : > { %v460_v18 = vpop.permute.xlu0 %459 }
  0x9f   : > { %v465_v29 = vpop.permute.xlu1 %464 }
  0xa2   : > { %v470_v25 = vpop.permute.xlu0 %469 }
 0x100   : > { %v646_v35 = vpop.f32.mrb[0].mxu0 }
 0x101   : > { %v647_v37 = vadd.f32 %v646_v35, %v430_v33  ;;  %v648_v38 = vpop.f32.mrb[1].mxu0 }
 0x102   : > { %v649_v39 = vadd.f32 %v648_v38, %v430_v33  ;;  %v650_v40 = vpop.f32.mrb[2].mxu0 }
 0x103   : > { %v651_v41 = vadd.f32 %v650_v40, %v435_v36  ;;  %v652_v42 = vpop.f32.mrb[3].mxu0  ;;  %v725_v45 = vmax.f32 %v647_v37, 0.0 }
 0x104   : > { %v653_v44 = vadd.f32 %v652_v42, %v435_v36  ;;  %v726_v47 = vmax.f32 %v649_v39, 0.0 }
 0x105   : > { %v727_v46 = vmax.f32 %v651_v41, 0.0  ;;  %v475_v41 = vpop.permute.xlu1 %474 }
 0x106   : > { %v728_v48 = vmax.f32 %v653_v44, 0.0 }
 0x107   : > { %v773_v49 = vpack.c.bf16 %v727_v46, %v725_v45 }
 0x108   : > { %v656_v50 = vpop.f32.mrb[4].mxu0  ;;  %v774_v51 = vpack.c.bf16 %v728_v48, %v726_v47 }
 0x109   : > { %v657_v52 = vadd.f32 %v656_v50, %v440_v43  ;;  %v658_v53 = vpop.f32.mrb[5].mxu0  ;;  %v480_v50 = vpop.permute.xlu0 %479 }
 0x10a   : > { %v659_v55 = vadd.f32 %v658_v53, %v440_v43  ;;  %v660_v56 = vpop.f32.mrb[6].mxu0  ;;  %901 = vmatprep.subr.bf16.mxu1 %v774_v51 }
 0x10b   : > { %v661_v57 = vadd.f32 %v660_v56, %v445_v54  ;;  %v662_v58 = vpop.f32.mrb[7].mxu0  ;;  %902 = vmatpush1.bf16.msra.mxu1 %v773_v49  ;;  %v729_v60 = vmax.f32 %v657_v52, 0.0 }
 0x10c   : > { %v663_v59 = vadd.f32 %v662_v58, %v445_v54  ;;  %v730_v62 = vmax.f32 %v659_v55, 0.0  ;;  %v485_v55 = vpop.permute.xlu1 %484 }
 0x10d   : > { %v731_v61 = vmax.f32 %v661_v57, 0.0 }
 0x10e   : > { %v732_v63 = vmax.f32 %v663_v59, 0.0 }
 0x10f   : > { %v775_v1 = vpack.c.bf16 %v731_v61, %v729_v60 }
 0x110   : > { %v776_v3 = vpack.c.bf16 %v732_v63, %v730_v62  ;;  %v666_v4 = vpop.f32.mrb[8].mxu0 }
 0x111   : > { %v667_v5 = vadd.f32 %v666_v4, %v450_v2  ;;  %v668_v6 = vpop.f32.mrb[9].mxu0 }
 0x112   : > { %v669_v8 = vadd.f32 %v668_v6, %v450_v2  ;;  %v670_v9 = vpop.f32.mrb[10].mxu0  ;;  %903 = vmatprep.subr.bf16.mxu1 %v776_v3  ;;  %v490_v3 = vpop.permute.xlu0 %489 }
 0x113   : > { %v671_v10 = vadd.f32 %v670_v9, %v455_v7  ;;  %v672_v11 = vpop.f32.mrb[11].mxu0  ;;  %904 = vmatpush1.bf16.msra.mxu1 %v775_v1  ;;  %v733_v13 = vmax.f32 %v667_v5, 0.0 }
 0x114   : > { %v673_v12 = vadd.f32 %v672_v11, %v455_v7  ;;  %v734_v15 = vmax.f32 %v669_v8, 0.0  ;;  %v495_v8 = vpop.permute.xlu1 %494 }
 0x115   : > { %v735_v14 = vmax.f32 %v671_v10, 0.0 }
 0x116   : > { %v736_v16 = vmax.f32 %v673_v12, 0.0 }
 0x117   : > { %v777_v17 = vpack.c.bf16 %v735_v14, %v733_v13 }
 0x118   : > { %v778_v19 = vpack.c.bf16 %v736_v16, %v734_v15  ;;  %v676_v20 = vpop.f32.mrb[12].mxu0 }
 0x119   : > { %v677_v24 = vadd.f32 %v676_v20, %v460_v18  ;;  %v678_v28 = vpop.f32.mrb[13].mxu0 }
 0x11a   : > { %v679_v30 = vadd.f32 %v678_v28, %v460_v18  ;;  %v680_v31 = vpop.f32.mrb[14].mxu0  ;;  %905 = vmatprep.subr.bf16.mxu1 %v778_v19  ;;  %v500_v19 = vpop.permute.xlu0 %499 }
 0x11b   : > { %v681_v21 = vadd.f32 %v680_v31, %v465_v29  ;;  %v682_v22 = vpop.f32.mrb[15].mxu0  ;;  %906 = vmatpush1.bf16.msra.mxu1 %v777_v17  ;;  %v737_v33 = vmax.f32 %v677_v24, 0.0 }
 0x11c   : > { %v683_v32 = vadd.f32 %v682_v22, %v465_v29  ;;  %v738_v35 = vmax.f32 %v679_v30, 0.0  ;;  %v505_v30 = vpop.permute.xlu1 %504 }
 0x11d   : > { %v739_v34 = vmax.f32 %v681_v21, 0.0 }
 0x11e   : > { %v740_v23 = vmax.f32 %v683_v32, 0.0 }
 0x11f   : > { %v779_v36 = vpack.c.bf16 %v739_v34, %v737_v33 }
 0x120   : > { %v780_v37 = vpack.c.bf16 %v740_v23, %v738_v35  ;;  %v686_v38 = vpop.f32.mrb[16].mxu0 }
 0x121   : > { %v687_v39 = vadd.f32 %v686_v38, %v470_v25  ;;  %v688_v40 = vpop.f32.mrb[17].mxu0  ;;  %v1906_v38 = vld [vmem:[%s2677_s3] sm:$0xff]  }
 0x122   : > { %v689_v42 = vadd.f32 %v688_v40, %v470_v25  ;;  %v690_v43 = vpop.f32.mrb[18].mxu0  ;;  %907 = vmatprep.subr.bf16.mxu1 %v780_v37  ;;  %v1908_v40 = vld [vmem:[%s2677_s3 + $0x10] sm:$0xff]  }
 0x123   : > { %v691_v26 = vadd.f32 %v690_v43, %v475_v41  ;;  %v692_v27 = vpop.f32.mrb[19].mxu0  ;;  %908 = vmatpush1.bf16.msra.mxu1 %v779_v36  ;;  %v741_v45 = vmax.f32 %v687_v39, 0.0  ;;  %v1907_v39 = vld [vmem:[%s2677_s3 + $0x8] sm:$0xff]  }
 0x124   : > { %v693_v44 = vadd.f32 %v692_v27, %v475_v41  ;;  %v742_v47 = vmax.f32 %v689_v42, 0.0  ;;  %v1909_v41 = vld [vmem:[%s2677_s3 + $0x18] sm:$0xff]   ;;  %v1910_v42 = vld [vmem:[%s2677_s3 + $0x20] sm:$0xff]   ;;  %v1911_v43 = vld [vmem:[%s2677_s3 + $0x28] sm:$0xff]  }
 0x125   : > { %v743_v46 = vmax.f32 %v691_v26, 0.0  ;;  %v1912_v26 = vld [vmem:[%s2677_s3 + $0x30] sm:$0xff]   ;;  %v1913_v27 = vld [vmem:[%s2677_s3 + $0x38] sm:$0xff]  }
 0x126   : > { %v744_v48 = vmax.f32 %v693_v44, 0.0  ;;  %v1068_v44 = vld [vmem:[%s2680_s6] sm:$0xff] }
 0x127   : > { %v781_v49 = vpack.c.bf16 %v743_v46, %v741_v45  ;;  %1076 = vperm.xlu1 %1884, %v1068_v44   ;;  %v1070_v45 = vld [vmem:[%s2680_s6 + $0x10] sm:$0xff]  ;;  %v1069_v46 = vld [vmem:[%s2680_s6 + $0x8] sm:$0xff] }
 0x128   : > { %v782_v51 = vpack.c.bf16 %v744_v48, %v742_v47  ;;  %v696_v52 = vpop.f32.mrb[20].mxu0  ;;  %1086 = vperm.xlu0 %1885, %v1070_v45   ;;  %v1071_v47 = vld [vmem:[%s2680_s6 + $0x18] sm:$0xff]  ;;  %v1072_v48 = vld [vmem:[%s2680_s6 + $0x20] sm:$0xff] }
 0x129   : > { %v697_v53 = vadd.f32 %v696_v52, %v480_v50  ;;  %v698_v54 = vpop.f32.mrb[21].mxu0 }
 0x12a   : > { %v699_v56 = vadd.f32 %v698_v54, %v480_v50  ;;  %v700_v57 = vpop.f32.mrb[22].mxu0  ;;  %909 = vmatprep.subr.bf16.mxu1 %v782_v51  ;;  %v791_v50 = vpop.permute.xlu0 %790 }
 0x12b   : > { %v701_v58 = vadd.f32 %v700_v57, %v485_v55  ;;  %v702_v59 = vpop.f32.mrb[23].mxu0  ;;  %910 = vmatpush1.bf16.msra.mxu1 %v781_v49  ;;  %v745_v61 = vmax.f32 %v697_v53, 0.0  ;;  %1081 = vperm.xlu1 %1884, %v1069_v46   ;;  %v1073_v49 = vld [vmem:[%s2680_s6 + $0x28] sm:$0xff]  ;;  %v795_v51 = vpop.permute.xlu1 %794 }
 0x12c   : > { %v703_v60 = vadd.f32 %v702_v59, %v485_v55  ;;  %v746_v63 = vmax.f32 %v699_v56, 0.0  ;;  %1091 = vperm.xlu0 %1885, %v1071_v47  }
 0x12d   : > { %v747_v62 = vmax.f32 %v701_v58, 0.0 }
 0x12e   : > { %v748_v1 = vmax.f32 %v703_v60, 0.0 }
 0x12f   : > { %v783_v2 = vpack.c.bf16 %v747_v62, %v745_v61  ;;  %1096 = vperm.xlu1 %1884, %v1072_v48   ;;  %v799_v62 = vpop.permute.xlu1 %798 }
 0x130   : > { %v784_v4 = vpack.c.bf16 %v748_v1, %v746_v63  ;;  %v706_v5 = vpop.f32.mrb[24].mxu0 }
 0x131   : > { %v707_v6 = vadd.f32 %v706_v5, %v490_v3  ;;  %v708_v7 = vpop.f32.mrb[25].mxu0 }
 0x132   : > { %v709_v9 = vadd.f32 %v708_v7, %v490_v3  ;;  %v710_v10 = vpop.f32.mrb[26].mxu0  ;;  %911 = vmatprep.subr.bf16.mxu1 %v784_v4  ;;  %v803_v7 = vpop.permute.xlu0 %802 }
 0x133   : > { %v711_v11 = vadd.f32 %v710_v10, %v495_v8  ;;  %v712_v12 = vpop.f32.mrb[27].mxu0  ;;  %912 = vmatpush1.bf16.msra.mxu1 %v783_v2  ;;  %v749_v14 = vmax.f32 %v707_v6, 0.0  ;;  %1101 = vperm.xlu1 %1884, %v1073_v49  }
 0x134   : > { %v713_v13 = vadd.f32 %v712_v12, %v495_v8  ;;  %v750_v16 = vmax.f32 %v709_v9, 0.0 }
 0x135   : > { %v751_v15 = vmax.f32 %v711_v11, 0.0 }
 0x136   : > { %v752_v17 = vmax.f32 %v713_v13, 0.0 }
 0x137   : > { %v785_v18 = vpack.c.bf16 %v751_v15, %v749_v14 }
 0x138   : > { %v786_v20 = vpack.c.bf16 %v752_v17, %v750_v16  ;;  %v716_v24 = vpop.f32.mrb[28].mxu0 }
 0x139   : > { %v717_v28 = vadd.f32 %v716_v24, %v500_v19  ;;  %v718_v29 = vpop.f32.mrb[29].mxu0 }
 0x13a   : > { %v719_v31 = vadd.f32 %v718_v29, %v500_v19  ;;  %v720_v21 = vpop.f32.mrb[30].mxu0  ;;  %913 = vmatprep.subr.bf16.mxu1 %v786_v20  ;;  %v811_v29 = vpop.permute.xlu0 %810 }
 0x13b   : > { %v721_v22 = vadd.f32 %v720_v21, %v505_v30  ;;  %v722_v32 = vpop.f32.mrb[31].mxu0  ;;  %914 = vmatpush1.bf16.msra.mxu1 %v785_v18  ;;  %v753_v34 = vmax.f32 %v717_v28, 0.0  ;;  %v807_v18 = vpop.permute.xlu1 %806 }
 0x13c   : > { %v723_v33 = vadd.f32 %v722_v32, %v505_v30  ;;  %v754_v23 = vmax.f32 %v719_v31, 0.0 }
 0x13d   : > { %v755_v35 = vmax.f32 %v721_v22, 0.0 }
 0x13e   : > { %v756_v36 = vmax.f32 %v723_v33, 0.0 }
 0x13f   : > { %v787_v25 = vpack.c.bf16 %v755_v35, %v753_v34 }
 0x140   : > { %v788_v37 = vpack.c.bf16 %v756_v36, %v754_v23 }
 0x142   : > { %915 = vmatprep.subr.bf16.mxu1 %v788_v37 }
 0x143   : > { %916 = vmatpush1.bf16.msra.mxu1 %v787_v25  ;;  %v815_v25 = vpop.permute.xlu1 %814 }
 0x146   : > { %934 = vmatmul.mubr.bf16.vlgmr.msra.gmra.mrb[0].mxu1 %v1906_v38 }
 0x147   : > { %943 = vmatprep.mubr.bf16.mxu1 %v2037_v0 }
 0x14e   : > { %944 = vmatmul.mubr.bf16.gmra.mrb[4].mxu1 %v1907_v39 }
 0x14f   : > { %953 = vmatprep.mubr.bf16.mxu1 %v2037_v0 }
 0x156   : > { %954 = vmatmul.mubr.bf16.gmra.mrb[8].mxu1 %v1908_v40 }
 0x157   : > { %963 = vmatprep.mubr.bf16.mxu1 %v2037_v0 }
 0x15e   : > { %964 = vmatmul.mubr.bf16.gmra.mrb[12].mxu1 %v1909_v41  ;;  %v819_v41 = vpop.permute.xlu0 %818 }
 0x15f   : > { %973 = vmatprep.mubr.bf16.mxu1 %v2037_v0 }
 0x166   : > { %974 = vmatmul.mubr.bf16.gmra.mrb[16].mxu1 %v1910_v42 }
 0x167   : > { %983 = vmatprep.mubr.bf16.mxu1 %v2037_v0 }
 0x16e   : > { %984 = vmatmul.mubr.bf16.gmra.mrb[20].mxu1 %v1911_v43 }
 0x16f   : > { %993 = vmatprep.mubr.bf16.mxu1 %v2037_v0 }
 0x176   : > { %994 = vmatmul.mubr.bf16.gmra.mrb[24].mxu1 %v1912_v26 }
 0x177   : > { %1003 = vmatprep.mubr.bf16.mxu1 %v2037_v0 }
 0x17e   : > { %1004 = vmatmul.mubr.bf16.gmra.mrb[28].mxu1 %v1913_v27 }
 0x219   : > { %v935_v52 = vpop.f32.mrb[0].mxu1 }
 0x21a   : > { %v936_v53 = vadd.f32 %v935_v52, %v791_v50  ;;  %v937_v54 = vpop.f32.mrb[1].mxu1 }
 0x21b   : > { %v938_v55 = vadd.f32 %v937_v54, %v791_v50  ;;  %v939_v56 = vpop.f32.mrb[2].mxu1  ;;  %v823_v50 = vpop.permute.xlu1 %822 }
 0x21c   : > { %v940_v57 = vadd.f32 %v939_v56, %v795_v51  ;;  %v941_v58 = vpop.f32.mrb[3].mxu1  ;;  %v1014_v60 = vmax.f32 %v936_v53, 0.0 }
 0x21d   : > { %v942_v59 = vadd.f32 %v941_v58, %v795_v51  ;;  %v1015_v63 = vmax.f32 %v938_v55, 0.0  ;;  %v827_v55 = vpop.permute.xlu0 %826 }
 0x21e   : > { %v1016_v61 = vmax.f32 %v940_v57, 0.0 }
 0x21f   : > { %v1017_v1 = vmax.f32 %v942_v59, 0.0 }
 0x220   : > { %v1052_v2 = vpack.c.bf16 %v1016_v61, %v1014_v60 }
 0x221   : > { %v1053_v3 = vpack.c.bf16 %v1017_v1, %v1015_v63  ;;  %v945_v4 = vpop.f32.mrb[4].mxu1 }
 0x222   : > { %v946_v5 = vadd.f32 %v945_v4, %v799_v62  ;;  %v947_v6 = vpop.f32.mrb[5].mxu1 }
 0x223   : > { %v948_v8 = vadd.f32 %v947_v6, %v799_v62  ;;  %v949_v9 = vpop.f32.mrb[6].mxu1  ;;  %1122 = vmatprep.subr.bf16.mxu0 %v1053_v3  ;;  %v831_v3 = vpop.permute.xlu1 %830 }
 0x224   : > { %v950_v10 = vadd.f32 %v949_v9, %v803_v7  ;;  %v951_v11 = vpop.f32.mrb[7].mxu1  ;;  %1123 = vmatpush1.bf16.msra.mxu0 %v1052_v2  ;;  %v1018_v13 = vmax.f32 %v946_v5, 0.0 }
 0x225   : > { %v952_v12 = vadd.f32 %v951_v11, %v803_v7  ;;  %v1019_v15 = vmax.f32 %v948_v8, 0.0  ;;  %v835_v8 = vpop.permute.xlu0 %834 }
 0x226   : > { %v1020_v14 = vmax.f32 %v950_v10, 0.0 }
 0x227   : > { %v1021_v16 = vmax.f32 %v952_v12, 0.0 }
 0x228   : > { %v1054_v17 = vpack.c.bf16 %v1020_v14, %v1018_v13 }
 0x229   : > { %v1055_v19 = vpack.c.bf16 %v1021_v16, %v1019_v15  ;;  %v955_v20 = vpop.f32.mrb[8].mxu1 }
 0x22a   : > { %v956_v24 = vadd.f32 %v955_v20, %v807_v18  ;;  %v957_v28 = vpop.f32.mrb[9].mxu1 }
 0x22b   : > { %v958_v30 = vadd.f32 %v957_v28, %v807_v18  ;;  %v959_v31 = vpop.f32.mrb[10].mxu1  ;;  %1124 = vmatprep.subr.bf16.mxu0 %v1055_v19  ;;  %v839_v19 = vpop.permute.xlu1 %838 }
 0x22c   : > { %v960_v21 = vadd.f32 %v959_v31, %v811_v29  ;;  %v961_v22 = vpop.f32.mrb[11].mxu1  ;;  %1125 = vmatpush1.bf16.msra.mxu0 %v1054_v17  ;;  %v1022_v33 = vmax.f32 %v956_v24, 0.0 }
 0x22d   : > { %v962_v32 = vadd.f32 %v961_v22, %v811_v29  ;;  %v1023_v35 = vmax.f32 %v958_v30, 0.0  ;;  %v843_v30 = vpop.permute.xlu0 %842 }
 0x22e   : > { %v1024_v34 = vmax.f32 %v960_v21, 0.0 }
 0x22f   : > { %v1025_v23 = vmax.f32 %v962_v32, 0.0 }
 0x230   : > { %v1056_v36 = vpack.c.bf16 %v1024_v34, %v1022_v33 }
 0x231   : > { %v1057_v37 = vpack.c.bf16 %v1025_v23, %v1023_v35  ;;  %v965_v38 = vpop.f32.mrb[12].mxu1 }
 0x232   : > { %v966_v39 = vadd.f32 %v965_v38, %v815_v25  ;;  %v967_v40 = vpop.f32.mrb[13].mxu1 }
 0x233   : > { %v968_v42 = vadd.f32 %v967_v40, %v815_v25  ;;  %v969_v43 = vpop.f32.mrb[14].mxu1  ;;  %1126 = vmatprep.subr.bf16.mxu0 %v1057_v37  ;;  %v847_v37 = vpop.permute.xlu1 %846 }
 0x234   : > { %v970_v26 = vadd.f32 %v969_v43, %v819_v41  ;;  %v971_v27 = vpop.f32.mrb[15].mxu1  ;;  %1127 = vmatpush1.bf16.msra.mxu0 %v1056_v36  ;;  %v1026_v45 = vmax.f32 %v966_v39, 0.0 }
 0x235   : > { %v972_v44 = vadd.f32 %v971_v27, %v819_v41  ;;  %v1027_v47 = vmax.f32 %v968_v42, 0.0  ;;  %v851_v42 = vpop.permute.xlu0 %850 }
 0x236   : > { %v1028_v46 = vmax.f32 %v970_v26, 0.0 }
 0x237   : > { %v1029_v48 = vmax.f32 %v972_v44, 0.0 }
 0x238   : > { %v1058_v49 = vpack.c.bf16 %v1028_v46, %v1026_v45 }
 0x239   : > { %v1059_v51 = vpack.c.bf16 %v1029_v48, %v1027_v47  ;;  %v975_v52 = vpop.f32.mrb[16].mxu1 }
 0x23a   : > { %v976_v53 = vadd.f32 %v975_v52, %v823_v50  ;;  %v977_v54 = vpop.f32.mrb[17].mxu1  ;;  %v1914_v52 = vld [vmem:[%s2678_s4] sm:$0xff]  }
 0x23b   : > { %v978_v56 = vadd.f32 %v977_v54, %v823_v50  ;;  %v979_v57 = vpop.f32.mrb[18].mxu1  ;;  %1128 = vmatprep.subr.bf16.mxu0 %v1059_v51  ;;  %v1916_v54 = vld [vmem:[%s2678_s4 + $0x10] sm:$0xff]  }
 0x23c   : > { %v980_v58 = vadd.f32 %v979_v57, %v827_v55  ;;  %v981_v59 = vpop.f32.mrb[19].mxu1  ;;  %1129 = vmatpush1.bf16.msra.mxu0 %v1058_v49  ;;  %v1030_v61 = vmax.f32 %v976_v53, 0.0  ;;  %v1915_v53 = vld [vmem:[%s2678_s4 + $0x8] sm:$0xff]  }
 0x23d   : > { %v982_v60 = vadd.f32 %v981_v59, %v827_v55  ;;  %v1031_v63 = vmax.f32 %v978_v56, 0.0  ;;  %v1077_v55 = vpop.permute.xlu1 %1076 }
 0x23e   : > { %v1032_v62 = vmax.f32 %v980_v58, 0.0 }
 0x23f   : > { %v1033_v1 = vmax.f32 %v982_v60, 0.0 }
 0x240   : > { %v1060_v2 = vpack.c.bf16 %v1032_v62, %v1030_v61  ;;  %v1087_v62 = vpop.permute.xlu0 %1086 }
 0x241   : > { %v1061_v4 = vpack.c.bf16 %v1033_v1, %v1031_v63  ;;  %v985_v5 = vpop.f32.mrb[20].mxu1 }
 0x242   : > { %v986_v6 = vadd.f32 %v985_v5, %v831_v3  ;;  %v987_v7 = vpop.f32.mrb[21].mxu1 }
 0x243   : > { %v988_v9 = vadd.f32 %v987_v7, %v831_v3  ;;  %v989_v10 = vpop.f32.mrb[22].mxu1  ;;  %1130 = vmatprep.subr.bf16.mxu0 %v1061_v4  ;;  %v1570_v4 = vlaneseq  ;;  %v2040_v7 = vmov 0.0  }
 0x244   : > { %v990_v11 = vadd.f32 %v989_v10, %v835_v8  ;;  %v991_v12 = vpop.f32.mrb[23].mxu1  ;;  %1131 = vmatpush1.bf16.msra.mxu0 %v1060_v2  ;;  %v1034_v14 = vmax.f32 %v986_v6, 0.0 }
 0x245   : > { %v992_v13 = vadd.f32 %v991_v12, %v835_v8  ;;  %v1035_v16 = vmax.f32 %v988_v9, 0.0 }
 0x246   : > { %v1036_v15 = vmax.f32 %v990_v11, 0.0 }
 0x247   : > { %v1037_v17 = vmax.f32 %v992_v13, 0.0  ;;  %v1082_v13 = vpop.permute.xlu1 %1081 }
 0x248   : > { %v1062_v18 = vpack.c.bf16 %v1036_v15, %v1034_v14 }
 0x249   : > { %v1063_v20 = vpack.c.bf16 %v1037_v17, %v1035_v16  ;;  %v995_v24 = vpop.f32.mrb[24].mxu1 }
 0x24a   : > { %v996_v28 = vadd.f32 %v995_v24, %v839_v19  ;;  %v997_v29 = vpop.f32.mrb[25].mxu1  ;;  %v1092_v24 = vpop.permute.xlu0 %1091 }
 0x24b   : > { %v998_v31 = vadd.f32 %v997_v29, %v839_v19  ;;  %v999_v21 = vpop.f32.mrb[26].mxu1  ;;  %1132 = vmatprep.subr.bf16.mxu0 %v1063_v20  ;;  %v2408_v29 = vshrl.u32 %v1570_v4, 7 }
 0x24c   : > { %v1000_v22 = vadd.f32 %v999_v21, %v843_v30  ;;  %v1001_v32 = vpop.f32.mrb[27].mxu1  ;;  %1133 = vmatpush1.bf16.msra.mxu0 %v1062_v18  ;;  %v1038_v34 = vmax.f32 %v996_v28, 0.0 }
 0x24d   : > { %v1002_v33 = vadd.f32 %v1001_v32, %v843_v30  ;;  %v1039_v23 = vmax.f32 %v998_v31, 0.0 }
 0x24e   : > { %v1040_v35 = vmax.f32 %v1000_v22, 0.0 }
 0x24f   : > { %v1041_v36 = vmax.f32 %v1002_v33, 0.0 }
 0x250   : > { %v1064_v25 = vpack.c.bf16 %v1040_v35, %v1038_v34 }
 0x251   : > { %v1065_v38 = vpack.c.bf16 %v1041_v36, %v1039_v23  ;;  %v1005_v39 = vpop.f32.mrb[28].mxu1 }
 0x252   : > { %v1006_v40 = vadd.f32 %v1005_v39, %v847_v37  ;;  %v1007_v41 = vpop.f32.mrb[29].mxu1 }
 0x253   : > { %v1008_v43 = vadd.f32 %v1007_v41, %v847_v37  ;;  %v1009_v26 = vpop.f32.mrb[30].mxu1  ;;  %1134 = vmatprep.subr.bf16.mxu0 %v1065_v38 }
 0x254   : > { %v1010_v27 = vadd.f32 %v1009_v26, %v851_v42  ;;  %v1011_v44 = vpop.f32.mrb[31].mxu1  ;;  %1135 = vmatpush1.bf16.msra.mxu0 %v1064_v25  ;;  %v1042_v46 = vmax.f32 %v1006_v40, 0.0 }
 0x255   : > { %v1012_v45 = vadd.f32 %v1011_v44, %v851_v42  ;;  %v1043_v48 = vmax.f32 %v1008_v43, 0.0 }
 0x256   : > { %v1044_v47 = vmax.f32 %v1010_v27, 0.0 }
 0x257   : > { %v1045_v49 = vmax.f32 %v1012_v45, 0.0 }
 0x258   : > { %v1066_v50 = vpack.c.bf16 %v1044_v47, %v1042_v46 }
 0x259   : > { %v1067_v51 = vpack.c.bf16 %v1045_v49, %v1043_v48 }
 0x25b   : > { %1136 = vmatprep.subr.bf16.mxu0 %v1067_v51 }
 0x25c   : > { %1137 = vmatpush1.bf16.msra.mxu0 %v1066_v50 }
 0x25f   : > { %1155 = vmatmul.mubr.bf16.vlgmr.msra.gmra.mrb[32].mxu0 %v1914_v52 }
 0x260   : > { %1164 = vmatprep.mubr.bf16.mxu0 %v2037_v0 }
 0x267   : > { %1165 = vmatmul.mubr.bf16.gmra.mrb[36].mxu0 %v1915_v53 }
 0x268   : > { %1174 = vmatprep.mubr.bf16.mxu0 %v2037_v0  ;;  %v2039_v0 = vmov 1966171168  }
 0x269   : > { %v2375_v2 = vunpack.c.l.s4 %v2039_v0 }
 0x26b   : > { %v1569_v17 = vunpack.c.0.s8 %v2375_v2 }
 0x26f   : > { %1175 = vmatmul.mubr.bf16.gmra.mrb[40].mxu0 %v1916_v54 }
 0x332   : > { %v1156_v56 = vpop.f32.mrb[32].mxu0 }
 0x333   : > { %v2369_v57 = vadd.f32 %v1156_v56, %v1077_v55  ;;  %v1158_v58 = vpop.f32.mrb[33].mxu0 }
 0x334   : > { %v2371_v59 = vadd.f32 %v1158_v58, %v1077_v55  ;;  %v1160_v60 = vpop.f32.mrb[34].mxu0  ;;  %v1097_v55 = vpop.permute.xlu1 %1096 }
 0x335   : > { %v1162_v61 = vpop.f32.mrb[35].mxu0  ;;  %v1222_v63 = vrot.slane %v2369_v57, 7  ;;  %v2398_v18 = vadd.f32 %v1160_v60, %v1082_v13 }
 0x336   : > { %v1223_v1 = vrot.slane %v2371_v59, 7  ;;  %v2422_v33 = vadd.f32 %v1162_v61, %v1082_v13 }
 0x337   : > { %vm2378_vm1 = vcmp.gt.f32.partialorder %v2369_v57, %v1222_v63 }
 0x338   : > { %vm2383_vm2 = vcmp.gt.f32.partialorder %v2371_v59, %v1223_v1  ;;  %v1228_v6 = vsel %vm2378_vm1, %v2369_v57, %v1222_v63  ;;  %v1230_v8 = vsel %vm2378_vm1, 0.5235988, %v2040_v7 }
 0x339   : > { %v1229_v9 = vsel %vm2383_vm2, %v2371_v59, %v1223_v1  ;;  %v1231_v10 = vsel %vm2383_vm2, 0.5235988, %v2040_v7  ;;  %v1242_v11 = vrot.slane %v1228_v6, 7  ;;  %v1252_v12 = vrot.slane %v1230_v8, 7 }
 0x33a   : > { %v1166_v14 = vpop.f32.mrb[36].mxu0  ;;  %v1243_v15 = vrot.slane %v1229_v9, 7  ;;  %v1253_v16 = vrot.slane %v1231_v10, 7 }
 0x33b   : > { %v2400_v19 = vadd.f32 %v1166_v14, %v1087_v62  ;;  %v1168_v20 = vpop.f32.mrb[37].mxu0  ;;  %vm2403_vm3 = vcmp.gt.f32.partialorder %v2369_v57, %v1242_v11 }
 0x33c   : > { %v2410_v30 = vadd.f32 %v1168_v20, %v1087_v62  ;;  %v1170_v31 = vpop.f32.mrb[38].mxu0  ;;  %vm2413_vm4 = vcmp.gt.f32.partialorder %v2371_v59, %v1243_v15  ;;  %v1248_v22 = vsel %vm2403_vm3, %v2369_v57, %v1242_v11  ;;  %v1256_v32 = vsel %vm2403_vm3, 1.0471976, %v1252_v12 }
 0x33d   : > { %v1234_v34 = vrot.slane %v2400_v19, 7  ;;  %v1172_v35 = vpop.f32.mrb[39].mxu0  ;;  %v1249_v23 = vsel %vm2413_vm4, %v2371_v59, %v1243_v15  ;;  %v1257_v36 = vsel %vm2413_vm4, 1.0471976, %v1253_v16  ;;  %v2431_v37 = vadd.f32 %v1170_v31, %v1092_v24 }
 0x33e   : > { %v1235_v25 = vrot.slane %v2410_v30, 7  ;;  %v1268_v38 = vrot.slane %v1248_v22, 7  ;;  %v1269_v39 = vrot.slane %v1249_v23, 7  ;;  %v2433_v40 = vadd.f32 %v1172_v35, %v1092_v24 }
 0x33f   : > { %v1238_v41 = vsel %vm2378_vm1, %v2400_v19, %v1234_v34  ;;  %v1278_v42 = vrot.slane %v1256_v32, 7  ;;  %v1279_v43 = vrot.slane %v1257_v36, 7  ;;  %vm1207_vm1 = vcmask 1041408  }
 0x340   : > { %v1239_v26 = vsel %vm2383_vm2, %v2410_v30, %v1235_v25  ;;  %v1260_v27 = vrot.slane %v1238_v41, 7  ;;  %vm2442_vm5 = vcmp.gt.f32.partialorder %v2369_v57, %v1268_v38  ;;  %vm2447_vm6 = vcmp.gt.f32.partialorder %v2371_v59, %v1269_v39 }
 0x341   : > { %v1261_v46 = vrot.slane %v1239_v26, 7  ;;  %v1274_v47 = vsel %vm2442_vm5, %v2369_v57, %v1268_v38  ;;  %v1275_v48 = vsel %vm2447_vm6, %v2371_v59, %v1269_v39  ;;  %v1282_v49 = vsel %vm2442_vm5, 1.5707964, %v1278_v42 }
 0x342   : > { %v1264_v50 = vsel %vm2403_vm3, %v2400_v19, %v1260_v27  ;;  %v1283_v51 = vsel %vm2447_vm6, 1.5707964, %v1279_v43  ;;  %v1294_v52 = vrot.slane %v1274_v47, 7  ;;  %v1295_v53 = vrot.slane %v1275_v48, 7  ;;  %v1176_v54 = vpop.f32.mrb[40].mxu0 }
 0x343   : > { %v1265_v56 = vsel %vm2413_vm4, %v2410_v30, %v1261_v46  ;;  %v1286_v58 = vrot.slane %v1264_v50, 7  ;;  %v1304_v60 = vrot.slane %v1282_v49, 7  ;;  %v1305_v61 = vrot.slane %v1283_v51, 7  ;;  %v1178_v62 = vpop.f32.mrb[41].mxu0 }
 0x344   : > { %v1287_v63 = vrot.slane %v1265_v56, 7  ;;  %vm2468_vm7 = vcmp.gt.f32.partialorder %v2369_v57, %v1294_v52  ;;  %vm2473_vm8 = vcmp.gt.f32.partialorder %v2371_v59, %v1295_v53  ;;  %v2477_v3 = vadd.f32 %v1176_v54, %v1097_v55  ;;  %v2479_v5 = vpop.f32.mrb[42].mxu0 }
 0x345   : > { %v1290_v6 = vsel %vm2442_vm5, %v2400_v19, %v1286_v58  ;;  %v1300_v7 = vsel %vm2468_vm7, %v2369_v57, %v1294_v52  ;;  %v1301_v8 = vsel %vm2473_vm8, %v2371_v59, %v1295_v53  ;;  %v1308_v9 = vsel %vm2468_vm7, 2.0943952, %v1304_v60  ;;  %v2492_v10 = vpop.f32.mrb[43].mxu0 }
 0x346   : > { %v1291_v11 = vsel %vm2447_vm6, %v2410_v30, %v1287_v63  ;;  %v1309_v12 = vsel %vm2473_vm8, 2.0943952, %v1305_v61  ;;  %v1312_v13 = vrot.slane %v1290_v6, 7  ;;  %v1320_v14 = vrot.slane %v1300_v7, 7 }
 0x347   : > { %v1313_v15 = vrot.slane %v1291_v11, 7  ;;  %v1321_v16 = vrot.slane %v1301_v8, 7  ;;  %v1330_v20 = vrot.slane %v1308_v9, 7  ;;  %v1331_v24 = vrot.slane %v1309_v12, 7 }
 0x348   : > { %v1316_v28 = vsel %vm2468_vm7, %v2400_v19, %v1312_v13  ;;  %vm1324_vm9 = vcmp.gt.f32.partialorder %v2369_v57, %v1320_v14  ;;  %v1187_v31 = vrot.slane %v2477_v3, 7  ;;  %v2504_v21 = vadd.f32 %v1178_v62, %v1097_v55 }
 0x349   : > { %v1317_v22 = vsel %vm2473_vm8, %v2410_v30, %v1313_v15  ;;  %vm1325_vm10 = vcmp.gt.f32.partialorder %v2371_v59, %v1321_v16  ;;  %v1326_v32 = vsel %vm1324_vm9, %v2369_v57, %v1320_v14  ;;  %v1334_v34 = vsel %vm1324_vm9, 2.6179938, %v1330_v20 }
 0x34a   : > { %v1327_v35 = vsel %vm1325_vm10, %v2371_v59, %v1321_v16  ;;  %v1335_v23 = vsel %vm1325_vm10, 2.6179938, %v1331_v24  ;;  %v1338_v36 = vrot.slane %v1316_v28, 7  ;;  %v1339_v25 = vrot.slane %v1317_v22, 7 }
 0x34b   : > { %v1346_v38 = vrot.slane %v1326_v32, 7  ;;  %v1347_v39 = vrot.slane %v1327_v35, 7  ;;  %v1356_v41 = vrot.slane %v1334_v34, 7  ;;  %v1357_v42 = vrot.slane %v1335_v23, 7 }
 0x34c   : > { %v1342_v43 = vsel %vm1324_vm9, %v2400_v19, %v1338_v36  ;;  %v1343_v26 = vsel %vm1325_vm10, %v2410_v30, %v1339_v25  ;;  %v1191_v27 = vsub.f32 %v2477_v3, %v1187_v31  ;;  %v1188_v44 = vrot.slane %v2504_v21, 7 }
 0x34d   : > { %vm1350_vm11 = vcmp.gt.f32.partialorder %v2369_v57, %v1346_v38  ;;  %vm1351_vm12 = vcmp.gt.f32.partialorder %v2371_v59, %v1347_v39  ;;  %v1364_v45 = vrot.slane %v1342_v43, 7  ;;  %v1365_v46 = vrot.slane %v1343_v26, 7 }
 0x34e   : > { %v1352_v47 = vsel %vm1350_vm11, %v2369_v57, %v1346_v38  ;;  %v1353_v48 = vsel %vm1351_vm12, %v2371_v59, %v1347_v39  ;;  %v1360_v49 = vsel %vm1350_vm11, 3.1415927, %v1356_v41  ;;  %v1361_v50 = vsel %vm1351_vm12, 3.1415927, %v1357_v42 }
 0x34f   : > { %v1368_v51 = vsel %vm1350_vm11, %v2400_v19, %v1364_v45  ;;  %v1369_v52 = vsel %vm1351_vm12, %v2410_v30, %v1365_v46  ;;  %v1372_v53 = vrot.slane %v1352_v47, 7  ;;  %v1373_v54 = vrot.slane %v1353_v48, 7 }
 0x350   : > { %v1382_v55 = vrot.slane %v1360_v49, 7  ;;  %v1383_v56 = vrot.slane %v1361_v50, 7  ;;  %v1390_v58 = vrot.slane %v1368_v51, 7  ;;  %v1391_v60 = vrot.slane %v1369_v52, 7 }
 0x351   : > { %vm1376_vm13 = vcmp.gt.f32.partialorder %v2369_v57, %v1372_v53  ;;  %vm1377_vm14 = vcmp.gt.f32.partialorder %v2371_v59, %v1373_v54  ;;  %v1800_v61 = vmul.f32 -1.442695, %v1191_v27  ;;  %v1192_v62 = vsub.f32 %v2504_v21, %v1188_v44 }
 0x352   : > { %v1378_v63 = vsel %vm1376_vm13, %v2369_v57, %v1372_v53  ;;  %v1379_v1 = vsel %vm1377_vm14, %v2371_v59, %v1373_v54  ;;  %v1386_v0 = vsel %vm1376_vm13, 3.6651914, %v1382_v55  ;;  %v1387_v6 = vsel %vm1377_vm14, 3.6651914, %v1383_v56 }
 0x353   : > { %v1394_v7 = vsel %vm1376_vm13, %v2400_v19, %v1390_v58  ;;  %v1395_v8 = vsel %vm1377_vm14, %v2410_v30, %v1391_v60  ;;  %v1398_v9 = vrot.slane %v1378_v63, 7  ;;  %v1399_v11 = vrot.slane %v1379_v1, 7 }
 0x354   : > { %v1408_v12 = vrot.slane %v1386_v0, 7  ;;  %v1409_v13 = vrot.slane %v1387_v6, 7  ;;  %v1416_v14 = vrot.slane %v1394_v7, 7  ;;  %v1417_v15 = vrot.slane %v1395_v8, 7 }
 0x355   : > { %vm1402_vm15 = vcmp.gt.f32.partialorder %v2398_v18, %v1398_v9  ;;  %vm1403_vm0 = vcmp.gt.f32.partialorder %v2422_v33, %v1399_v11  ;;  %1917 = vpow2.f32 %v1800_v61  ;;  %v1801_v57 = vmul.f32 -1.442695, %v1192_v62 }
 0x356   : > { %vm1208_vm2 = vcmask 1045508   ;;  %v1404_v59 = vsel %vm1402_vm15, %v2398_v18, %v1398_v9  ;;  %v1405_v19 = vsel %vm1403_vm0, %v2422_v33, %v1399_v11  ;;  %v1412_v16 = vsel %vm1402_vm15, 4.1887903, %v1408_v12  ;;  %v1102_v11 = vpop.permute.xlu1 %1101 }
 0x357   : > { %v1413_v30 = vsel %vm1403_vm0, 4.1887903, %v1409_v13  ;;  %v1420_v20 = vsel %vm1402_vm15, %v2431_v37, %v1416_v14  ;;  %v1421_v24 = vsel %vm1403_vm0, %v2433_v40, %v1417_v15  ;;  %v1424_v28 = vrot.slane %v1404_v59, 7  ;;  %vm2554_vm7 = vmor %vm1207_vm1, %vm1208_vm2  ;;  %v394_v13 = vld [vmem:[%s371_s20] sm:$0x77]  ;;  %s1929_s20 = sshll.u32 %s2041_s16, 4  ;;  %s1930_s20 = int_to_ptr.vmem [resolvable:$false] %s1929_s20 }
 0x358   : > { %v1425_v31 = vrot.slane %v1405_v19, 7  ;;  %v1434_v22 = vrot.slane %v1412_v16, 7  ;;  %v1435_v32 = vrot.slane %v1413_v30, 7  ;;  %v1442_v34 = vrot.slane %v1420_v20, 7  ;;  %s1931_s22 = scalar_lea.vmem %s1930_s20, 64  ;;  %p1932_p1 = scmp.lt.s32.totalorder %s2589_s26, %s1930_s20 }
 0x359   : > { %v1443_v35 = vrot.slane %v1421_v24, 7  ;;  %vm1428_vm3 = vcmp.gt.f32.partialorder %v2398_v18, %v1424_v28  ;;  %1919 = vpow2.f32 %v1801_v57  ;;  %v1205_v23 = vcombine.low %v2477_v3, %v2504_v21  ;;  %p1933_p2 = scmp.lt.s32.totalorder %s1931_s22, %s1925_s19 }
 0x35a   : > { %vm1429_vm4 = vcmp.gt.f32.partialorder %v2422_v33, %v1425_v31  ;;  %v1430_v36 = vsel %vm1428_vm3, %v2398_v18, %v1424_v28  ;;  %v1438_v38 = vsel %vm1428_vm3, 4.712389, %v1434_v22  ;;  %v1446_v41 = vsel %vm1428_vm3, %v2431_v37, %v1442_v34 }
 0x35b   : > { %v1431_v25 = vsel %vm1429_vm4, %v2422_v33, %v1425_v31  ;;  %v1439_v39 = vsel %vm1429_vm4, 4.712389, %v1435_v32  ;;  %v1447_v42 = vsel %vm1429_vm4, %v2433_v40, %v1443_v35  ;;  %v1450_v43 = vrot.slane %v1430_v36, 7  ;;  %p1934_p3 = por %p1933_p2, %p1932_p1 }
 0x35c   : > { %v1451_v26 = vrot.slane %v1431_v25, 7  ;;  %v1460_v27 = vrot.slane %v1438_v38, 7  ;;  %v1461_v44 = vrot.slane %v1439_v39, 7  ;;  %v1468_v45 = vrot.slane %v1446_v41, 7 }
 0x35d   : > { %v1469_v46 = vrot.slane %v1447_v42, 7  ;;  %vm1454_vm5 = vcmp.gt.f32.partialorder %v2398_v18, %v1450_v43  ;;  %v1206_v47 = vcombine.high %v2477_v3, %v2504_v21  ;;  %v1802_v48 = vrot.slane %v1205_v23, 10  ;;  %p1935_p5 = pnand %p1934_p3, %p1928_p0 }
 0x35e   : > { %vm1455_vm6 = vcmp.gt.f32.partialorder %v2422_v33, %v1451_v26  ;;  %v1456_v49 = vsel %vm1454_vm5, %v2398_v18, %v1450_v43  ;;  %v1464_v51 = vsel %vm1454_vm5, 5.2359877, %v1460_v27  ;;  %v1472_v54 = vsel %vm1454_vm5, %v2431_v37, %v1468_v45 }
 0x35f   : > { %v1457_v50 = vsel %vm1455_vm6, %v2422_v33, %v1451_v26  ;;  %v1465_v52 = vsel %vm1455_vm6, 5.2359877, %v1461_v44  ;;  %v1918_v53 = vpop.eup %1917  ;;  %v1473_v55 = vsel %vm1455_vm6, %v2433_v40, %v1469_v46  ;;  %v1476_v56 = vrot.slane %v1456_v49, 7 }
 0x360   : > { %v1477_v58 = vrot.slane %v1457_v50, 7  ;;  %v1484_v60 = vrot.slane %v1464_v51, 7  ;;  %v1485_v61 = vrot.slane %v1465_v52, 7  ;;  %v1492_v62 = vrot.slane %v1472_v54, 7 }
 0x361   : > { %v1493_v3 = vrot.slane %v1473_v55, 7  ;;  %vm1480_vm8 = vcmp.gt.f32.partialorder %v2398_v18, %v1476_v56  ;;  %v1199_v63 = vadd.f32 1.0, %v1918_v53  ;;  %v1212_v1 = vrot.slane %v1206_v47, 6 }
 0x362   : > { %vm1481_vm9 = vcmp.gt.f32.partialorder %v2422_v33, %v1477_v58  ;;  %v1488_v0 = vsel %vm1480_vm8, 5.7595863, %v1484_v60  ;;  %v1496_v7 = vsel %vm1480_vm8, %v2431_v37, %v1492_v62  ;;  %v1181_v37 = vadd.f32 %v2479_v5, %v1102_v11 }
 0x363   : > { %v1489_v6 = vsel %vm1481_vm9, 5.7595863, %v1485_v61  ;;  %v1497_v8 = vsel %vm1481_vm9, %v2433_v40, %v1493_v3  ;;  %v1920_v9 = vpop.eup %1919  ;;  %v2568_v18 = vadd.f32 %v1496_v7, %v1488_v0  ;;  %1921 = vrcp.f32 %v1199_v63 }
 0x364   : > { %v2570_v33 = vadd.f32 %v1497_v8, %v1489_v6  ;;  %v1213_v12 = vsel %vm2554_vm7, %v1802_v48, %v1212_v1  ;;  %v1200_v14 = vadd.f32 1.0, %v1920_v9  ;;  %v1183_v57 = vadd.f32 %v2492_v10, %v1102_v11 }
 0x365   : > { %v1500_v40 = vand.u32 2147483647, %v2568_v18  ;;  %v1572_v59 = vsub.s32 %v1569_v17, %v2408_v29  ;;  %v1803_v30 = vrot.slane %v1206_v47, 9  ;;  %v1215_v20 = vsub.f32 %v394_v13, %v1213_v12 }
 0x366   : > { %v1511_v15 = vand.u32 2147483647, %v2570_v33  ;;  %1923 = vrcp.f32 %v1200_v14  ;;  %v1566_v24 = vcombine.low %v1181_v37, %v1183_v57  ;;  %vm1584_vm10 = vcmp.lt.s32.totalorder %v1570_v4, 256 }
 0x367   : > { %v1502_v19 = vmul.f32 0.15915494, %v1500_v40  ;;  %v1219_v34 = vadd.f32 %v1803_v30, %v394_v13  ;;  %v1539_v35 = vcombine.high %v1215_v20, %v1215_v20  ;;  %vm1553_vm11 = vcmask 1040384  }
 0x368   : > { %v1513_v16 = vmul.f32 0.15915494, %v1511_v15  ;;  %v1573_v5 = vrot.slane %v1566_v24, %v1572_v59  ;;  %v1509_v23 = vand.u32 2147483648, %v2568_v18  ;;  %v1540_v36 = vrot.slane %v1215_v20, 7 }
 0x369   : > { %v1503_v28 = vfloor.f32 %v1502_v19  ;;  %vm1556_vm12 = vcmask 1043456   ;;  %v1520_v25 = vand.u32 2147483648, %v2570_v33  ;;  %v1545_v38 = vcombine.low %v1219_v34, %v1219_v34 }
 0x36a   : > { %v1514_v31 = vfloor.f32 %v1513_v16  ;;  %v1580_v10 = vrot.slane %v1573_v5, %v1572_v59 }
 0x36b   : > { %v1504_v22 = vmul.f32 6.2831855, %v1503_v28 }
 0x36c   : > { %v1515_v32 = vmul.f32 6.2831855, %v1514_v31  ;;  %1586 = vst.msk [vmem:[%s362_s25] sm:$0x3] %vm1584_vm10, %v1580_v10 }
 0x36d   : > { %v1922_v2 = vpop.eup %1921  ;;  %v1505_v17 = vsub.f32 %v1500_v40, %v1504_v22 }
 0x36e   : > { %v1516_v29 = vsub.f32 %v1511_v15, %v1515_v32  ;;  %v1534_v4 = vrot.slane %v1922_v2, 1 }
 0x36f   : > { %vm1506_vm13 = vcmp.eq.f32.partialorder %v1505_v17, 6.2831855 }
 0x370   : > { %vm1517_vm14 = vcmp.eq.f32.partialorder %v1516_v29, 6.2831855 }
 0x371   : > { %1938 = shalt.err (!%p1935_p5)
}
 0x372   : > { %s1939_s24 = scalar_lea.hbm %s2587_s12, 32  ;;  %s1943_s23 = scalar_lea.hbm %s2682_s8, 64 }
 0x373   : > { %p1940_p6 = scmp.ne.s32.totalorder %s2587_s12, %s1939_s24  ;;  %p1944_p10 = scmp.lt.u32.totalorder %s2587_s12, %s2682_s8 }
 0x374   : > { %p1945_p11 = scmp.lt.u32.totalorder %s1943_s23, %s1939_s24  ;;  %p1947_p13 = scmp.lt.u32.totalorder %s1939_s24, %s2587_s12 }
 0x375   : > { %p1941_p7 = pnand %p1940_p6, %p2128_p4 }
 0x376   : > { %p1946_p12 = por %p1945_p11, %p1944_p10 }
 0x377   : > { %p1942_p9 = pneg %p1941_p7 }
 0x378   : > { %p1948_p0 = por %p1947_p13, %p1946_p12 }
 0x37a   : > { %p1949_p1 = pnand %p1948_p0, %p1942_p9 }
 0x37c   : > { %1952 = shalt.err (!%p1949_p1)
}
 0x37d   : > { %1817 = dma.vmem_to_hbm [thread:$0]  (%p2128_p4), %s2589_s26, 32, %s2587_s12, %s1593_s14   ;;  %v1924_v39 = vpop.eup %1923  ;;  %v1507_v41 = vsel %vm1506_vm13, 0.0, %v1505_v17  ;;  %v1518_v42 = vsel %vm1517_vm14, 0.0, %v1516_v29  ;;  %v1541_v43 = vrot.slane %v1539_v35, 7  ;;  %v1554_v26 = vsel %vm1553_vm11, %v1534_v4, %v1540_v36 }
 0x37e   : > { %v1508_v27 = vand.u32 2147483647, %v1507_v41  ;;  %v1519_v44 = vand.u32 2147483647, %v1518_v42  ;;  %v1535_v45 = vrot.slane %v1924_v39, 1  ;;  %s1759_s19 = sshll.u32 %s2566_s21, 4  ;;  %v1557_v46 = vsel %vm1556_vm12, %v1554_v26, %v1545_v38 }
 0x37f   : > { %s1814_s26 = sshll.u32 %s2027_s30, 8  ;;  %s355_s12 = scalar_lea.vmem [#allocation2], %s1759_s19  ;;  %vm1559_vm5 = vcmask 1046528  }
 0x380   : > { %v1510_v47 = vor.u32 %v1509_v23, %v1508_v27  ;;  %v1521_v48 = vor.u32 %v1520_v25, %v1519_v44  ;;  %v1555_v49 = vsel %vm1553_vm11, %v1535_v45, %v1541_v43  ;;  %s1609_s14 = sshll.u32 %s355_s12, 4  ;;  %s2626_s25 = scalar_lea.hbm %s2681_s7, %s1814_s26  ;;  %s2628_s14 = int_to_ptr.vmem [resolvable:$true] %s1609_s14 }
 0x381   : > { %v1558_v50 = vsel %vm1556_vm12, %v1555_v49, %v1219_v34  ;;  %s1588_s30 = scalar_lea.sflag [#allocation3], %s2566_s21  ;;  %s1953_s11 = scalar_lea.vmem %s2628_s14, 256 }
 0x382   : > { %vm1522_vm15 = vcmp.ne.f32.partialorder %v1510_v47, 0.0  ;;  %vm1523_vm0 = vcmp.ne.f32.partialorder %v1521_v48, 0.0  ;;  %vm1524_vm1 = vcmp.lt.f32.partialorder %v1510_v47, 0.0  ;;  %vm1525_vm2 = vcmp.lt.f32.partialorder %v1521_v48, 0.0  ;;  %p1954_p2 = scmp.ne.s32.totalorder %s2628_s14, %s1953_s11  ;;  %s2042_s23 = smov [#allocation2]  }
 0x383   : > { %vm1526_vm3 = vmand %vm1524_vm1, %vm1522_vm15  ;;  %v1528_v51 = vadd.f32 6.2831855, %v1510_v47  ;;  %v1529_v52 = vadd.f32 6.2831855, %v1521_v48  ;;  %s1957_s16 = sshll.u32 %s2042_s23, 4  ;;  %s1958_s16 = int_to_ptr.vmem [resolvable:$false] %s1957_s16 }
 0x384   : > { %vm1527_vm4 = vmand %vm1525_vm2, %vm1523_vm0  ;;  %p1955_p3 = pnand %p1954_p2, %p2128_p4  ;;  %s1959_s20 = scalar_lea.vmem %s1958_s16, 512 }
 0x385   : > { %v1530_v53 = vsel %vm1526_vm3, %v1528_v51, %v1510_v47  ;;  %v1531_v54 = vsel %vm1527_vm4, %v1529_v52, %v1521_v48  ;;  %p1960_p6 = scmp.lt.s32.totalorder %s2628_s14, %s1958_s16  ;;  %p1961_p7 = scmp.lt.s32.totalorder %s1959_s20, %s1953_s11 }
 0x386   : > { %v1549_v55 = vrot.slane %v1530_v53, 4  ;;  %v1550_v56 = vrot.slane %v1531_v54, 4  ;;  %p1956_p5 = pneg %p1955_p3 }
 0x387   : > { %p1962_p9 = por %p1961_p7, %p1960_p6 }
 0x388   : > { %v1560_v58 = vsel %vm1559_vm5, %v1557_v46, %v1549_v55  ;;  %v1561_v60 = vsel %vm1559_vm5, %v1558_v50, %v1550_v56 }
 0x389   : > { %1562 = vst [vmem:[%s355_s12] sm:$0xff] %v1560_v58  ;;  %1563 = vst [vmem:[%s355_s12 + $0x8] sm:$0xff] %v1561_v60  ;;  %p1963_p10 = pnand %p1962_p9, %p1956_p5 }
 0x38b   : > { %1966 = shalt.err (!%p1963_p10)
}
 0x38c   : > { %s1967_s21 = scalar_lea.hbm %s2626_s25, 256  ;;  %s1971_s12 = scalar_lea.hbm %s2681_s7, 512 }
 0x38d   : > { %p1968_p11 = scmp.ne.s32.totalorder %s2626_s25, %s1967_s21  ;;  %p1972_p0 = scmp.lt.u32.totalorder %s2626_s25, %s2681_s7 }
 0x38e   : > { %p1973_p1 = scmp.lt.u32.totalorder %s1971_s12, %s1967_s21  ;;  %p1975_p3 = scmp.lt.u32.totalorder %s1967_s21, %s2626_s25 }
 0x38f   : > { %p1969_p12 = pnand %p1968_p11, %p2128_p4 }
 0x390   : > { %p1974_p2 = por %p1973_p1, %p1972_p0 }
 0x391   : > { %p1970_p13 = pneg %p1969_p12 }
 0x392   : > { %p1976_p5 = por %p1975_p3, %p1974_p2 }
 0x394   : > { %p1977_p6 = pnand %p1976_p5, %p1970_p13 }
 0x396   : > { %1980 = shalt.err (!%p1977_p6)
}
 0x397   : > { %1816 = dma.vmem_to_hbm [thread:$0]  (%p2128_p4), %s2628_s14, 256, %s2626_s25, %s1588_s30  }
 0x398 PF: > { %p1827_p7 = scmp.ge.s32.totalorder %s2035_s10, 2  ;;  %s1637_s11 = sand.u32 1, %s2015_s27  }
 0x399   : > { %s1638_s23 = scalar_lea.sflag [#allocation3], %s1637_s11 }
 0x39a   : > { %p1821_p9 = pnand %p1827_p7, %p2135_p8 }
 0x39c   : > { %2006 = dma.done.wait (!%p1821_p9), %s1638_s23, 256  }
 0x39d   : > { %2008 = vsyncadd (!%p1821_p9), %s1638_s23, 4294967040  ;;  %s1647_s16 = scalar_lea.sflag [#allocation5], %s1637_s11 }
 0x39e   : > { %2010 = dma.done.wait (!%p1821_p9), %s1647_s16, 32  }
 0x39f   : > { %2012 = vsyncadd (!%p1821_p9), %s1647_s16, 4294967264  ;;  %s25_s10 = sadd.s32 1, %s2035_s10   ;;  %s2703_s27 = smov %s2019_s28 }
 0x3a0   : > { %p22_p10 = scmp.ge.s32.totalorder %s25_s10, 4   ;;  %s2704_s28 = smov %s2023_s29 }
 0x3a1   : > { %s2705_s29 = smov %s2141_s18  ;;  %s2706_s30 = smov %s2031_s9 }
 0x3a2   : > { %s2707_s9 = smov %s2709_s13  ;;  %24 = sbr.rel (!%p22_p10) target bundleno = 6 (0x6), region = 103 }
 0x3a9   :  { %1652 = vsyncpa [#allocation3], 1 }
 0x3aa   :  { %1654 = vsyncpa [#allocation3 + $0x1], 1 }
 0x3ab   :  { %1655 = vsyncpa [#allocation5], 1 }
 0x3ac   :  { %1657 = vsyncpa [#allocation5 + $0x1], 1 }

</bundles_post_ra>
